<compile_context>
chip_gen: v5e
topology: v5e:2x2
jax: 0.10.0
libtpu: 0.0.40
codegen_flags: <defaults>
</compile_context>

<pallas_src>
import functools

import jax
import jax.numpy as jnp
from jax.experimental import pallas as pl
from jax.experimental.pallas import tpu as pltpu

LANE = 128  # lane width: classifier output padded to a multiple of this


def shallow_nn_kernel(x_ref, w1_ref, b1_ref, w2_ref, b2_ref, wf_ref, bf_ref, o_ref):
    """Fused: (x @ W1 + b1) -> LeakyReLU -> (@ W2 + b2) -> LeakyReLU -> (@ Wf + bf).

    Weights are bf16 (MXU-native), activations are cast to bf16 only at the MXU
    boundary; accumulation, bias add and LeakyReLU happen in f32.
    """
    neg_slope = jnp.float32(0.01)

    # hidden layer 1
    h = jnp.dot(x_ref[...].astype(jnp.bfloat16), w1_ref[...],
                preferred_element_type=jnp.float32) + b1_ref[...]
    h = jnp.where(h > 0, h, neg_slope * h)          # LeakyReLU(0.01)
    # Dropout(p): identity in eval mode.
    # TODO(synk): training-mode dropout (pltpu.prng_* masks) not emitted here.

    # hidden layer 2
    h = jnp.dot(h.astype(jnp.bfloat16), w2_ref[...],
                preferred_element_type=jnp.float32) + b2_ref[...]
    h = jnp.where(h > 0, h, neg_slope * h)

    # final classifier (lane-dense: padded to 128 output columns)
    out = jnp.dot(h.astype(jnp.bfloat16), wf_ref[...],
                  preferred_element_type=jnp.float32) + bf_ref[...]
    o_ref[...] = out.astype(o_ref.dtype)


def shallow_nn_forward(x, params, num_classes, *, tm=128):
    """x: [B, C, H, W] (NCHW).  params: dict of bf16 transposed weights + f32 biases.

    tm: batch tile per grid step.  128 fills a v5e MXU pass; bump to 256 for
    v6e/v7x when the real batch is large enough to cover it.  Per-step VMEM
    footprint here is < 1 MiB, far under the v7x 32 MiB scoped default.
    """
    B = x.shape[0]
    x_flat = x.reshape(B, -1).astype(jnp.float32)    # torch.flatten(x, 1)
    input_dim = x_flat.shape[1]

    # Pad the batch up to a multiple of the tile so the grid is exact.
    b_pad = pl.cdiv(B, tm) * tm
    if b_pad != B:
        x_flat = jnp.pad(x_flat, ((0, b_pad - B), (0, 0)))
    n_tiles = b_pad // tm

    h1 = params["w1_t"].shape[1]
    h2 = params["w2_t"].shape[1]
    nc_pad = params["wf_t"].shape[1]                 # lane-padded classifier width

    cost = pl.CostEstimate(
        flops=2 * b_pad * (input_dim * h1 + h1 * h2 + h2 * nc_pad),
        transcendentals=0,
        bytes_accessed=(x_flat.size * 4
                        + params["w1_t"].size * 2
                        + params["w2_t"].size * 2
                        + params["wf_t"].size * 2
                        + params["b1"].size * 4
                        + params["b2"].size * 4
                        + params["bf"].size * 4
                        + b_pad * nc_pad * 4),
    )

    def resident(shape):
        # Full-array block, constant index -> stays in VMEM across grid steps.
        return pl.BlockSpec(shape, lambda i: (0, 0))

    out_padded = pl.pallas_call(
        shallow_nn_kernel,
        out_shape=jax.ShapeDtypeStruct((b_pad, nc_pad), jnp.float32),
        grid=(n_tiles,),
        in_specs=[
            pl.BlockSpec((tm, input_dim), lambda i: (i, 0)),   # activation tiles
            resident(params["w1_t"].shape),
            resident(params["b1"].shape),
            resident(params["w2_t"].shape),
            resident(params["b2"].shape),
            resident(params["wf_t"].shape),
            resident(params["bf"].shape),
        ],
        out_specs=pl.BlockSpec((tm, nc_pad), lambda i: (i, 0)),
        compiler_params=pltpu.CompilerParams(
            dimension_semantics=("parallel",)),                # v7x megacore
        cost_estimate=cost,
    )(
        x_flat,
        params["w1_t"], params["b1"],
        params["w2_t"], params["b2"],
        params["wf_t"], params["bf"],
    )

    # Strip batch padding and the lane-padded fake classes.
    return out_padded[:B, :num_classes]


def init_params(key, input_dim, hidden_dims, num_classes):
    """Deterministic init mimicking nn.Linear default (uniform +-1/sqrt(fan_in)).

    Weights are stored transposed [in_dim, out_dim] in bf16 (MXU-native, halves
    the dominant HBM traffic); biases are f32 [1, out_dim].  The classifier is
    zero-padded out to a lane-dense width (multiple of 128)."""
    dims = [input_dim] + list(hidden_dims)
    params = {}
    names = ["w1_t", "w2_t"]
    bnames = ["b1", "b2"]
    for i, (d_in, d_out) in enumerate(zip(dims[:-1], dims[1:])):
        key, kw, kb = jax.random.split(key, 3)
        bound = 1.0 / jnp.sqrt(d_in)
        params[names[i]] = jax.random.uniform(
            kw, (d_in, d_out), jnp.float32, -bound, bound).astype(jnp.bfloat16)
        params[bnames[i]] = jax.random.uniform(
            kb, (1, d_out), jnp.float32, -bound, bound)

    key, kw, kb = jax.random.split(key, 3)
    d_in = dims[-1]
    bound = 1.0 / jnp.sqrt(d_in)
    wf = jax.random.uniform(kw, (d_in, num_classes), jnp.float32, -bound, bound)
    bf = jax.random.uniform(kb, (1, num_classes), jnp.float32, -bound, bound)

    nc_pad = pl.cdiv(num_classes, LANE) * LANE
    params["wf_t"] = jnp.pad(
        wf, ((0, 0), (0, nc_pad - num_classes))).astype(jnp.bfloat16)
    params["bf"] = jnp.pad(bf, ((0, 0), (0, nc_pad - num_classes)))
    return params


def ref_forward(x, params, num_classes):
    """Pure-JAX reference of the identical math (bf16 weights, f32 accum)."""
    h = x.reshape(x.shape[0], -1).astype(jnp.float32)
    for w, b in ((params["w1_t"], params["b1"]), (params["w2_t"], params["b2"])):
        h = jnp.dot(h.astype(jnp.bfloat16), w,
                    preferred_element_type=jnp.float32) + b
        h = jnp.where(h > 0, h, 0.01 * h)
    out = jnp.dot(h.astype(jnp.bfloat16), params["wf_t"],
                  preferred_element_type=jnp.float32) + params["bf"]
    return out[:, :num_classes]


if __name__ == "__main__":
    # Module config (synthetic, deterministic):
    #   input x: [B=2, C=4, H=16, W=16]  =>  input_dim = 4*16*16 = 1024
    #   hidden_dims = [128, 64], num_classes = 10, dropout_prob = 0.1 (eval: no-op)
    B, C, H, W = 2, 4, 16, 16
    input_dim = C * H * W
    hidden_dims = [128, 64]
    num_classes = 10

    key = jax.random.PRNGKey(0)
    key, kx = jax.random.split(key)
    x = jax.random.normal(kx, (B, C, H, W), dtype=jnp.float32)

    params = init_params(key, input_dim, hidden_dims, num_classes)

    fwd = jax.jit(functools.partial(shallow_nn_forward, num_classes=num_classes))
    out = fwd(x, params)
    jax.block_until_ready(out)

    assert out.shape == (B, num_classes), out.shape

    ref_out = ref_forward(x, params, num_classes)
    assert jnp.allclose(out, ref_out, atol=2e-3, rtol=2e-3), (
        jnp.max(jnp.abs(out - ref_out)))

    print("KERNEL_OK")
</pallas_src>

<mosaic_0001>
module attributes {stable_mosaic.version = 11 : i64} {
  func.func @shallow_nn_kernel(%arg0: i32, %arg1: memref<128x1024xf32, #tpu.memory_space<vmem>>, %arg2: memref<1024x128xbf16, #tpu.memory_space<vmem>>, %arg3: memref<1x128xf32, #tpu.memory_space<vmem>>, %arg4: memref<128x64xbf16, #tpu.memory_space<vmem>>, %arg5: memref<1x64xf32, #tpu.memory_space<vmem>>, %arg6: memref<64x128xbf16, #tpu.memory_space<vmem>>, %arg7: memref<1x128xf32, #tpu.memory_space<vmem>>, %arg8: memref<128x128xf32, #tpu.memory_space<vmem>>) attributes {dimension_semantics = [#tpu.dimension_semantics<parallel>], iteration_bounds = array<i64: 1>, scalar_prefetch = 0 : i64, scratch_operands = 0 : i64, tpu.core_type = #tpu.core_type<tc>, window_params = [{transform_indices = @transform_0, window_bounds = array<i64: 128, 1024>}, {pipeline_mode = #tpu.pipeline_mode<synchronous>, transform_indices = @transform_1, window_bounds = array<i64: 1024, 128>}, {pipeline_mode = #tpu.pipeline_mode<synchronous>, transform_indices = @transform_2, window_bounds = array<i64: 1, 128>}, {pipeline_mode = #tpu.pipeline_mode<synchronous>, transform_indices = @transform_3, window_bounds = array<i64: 128, 64>}, {pipeline_mode = #tpu.pipeline_mode<synchronous>, transform_indices = @transform_4, window_bounds = array<i64: 1, 64>}, {pipeline_mode = #tpu.pipeline_mode<synchronous>, transform_indices = @transform_5, window_bounds = array<i64: 64, 128>}, {pipeline_mode = #tpu.pipeline_mode<synchronous>, transform_indices = @transform_6, window_bounds = array<i64: 1, 128>}, {transform_indices = @transform_7, window_bounds = array<i64: 128, 128>}]} {
    %c0 = arith.constant 0 : index
    %c0_0 = arith.constant 0 : index
    %0 = vector.load %arg1[%c0, %c0_0] : memref<128x1024xf32, #tpu.memory_space<vmem>>, vector<128x1024xf32>
    %1 = arith.truncf %0 : vector<128x1024xf32> to vector<128x1024xbf16>
    %c0_1 = arith.constant 0 : index
    %c0_2 = arith.constant 0 : index
    %2 = vector.load %arg2[%c0_1, %c0_2] : memref<1024x128xbf16, #tpu.memory_space<vmem>>, vector<1024x128xbf16>
    %cst = arith.constant dense<0.000000e+00> : vector<128x128xf32>
    %3 = tpu.matmul %1, %2, %cst {dimension_numbers = #tpu.dot_dimension_numbers<[1], [0], [0], [1], [0, 0, 1, 1], [], []>} : vector<128x1024xbf16>, vector<1024x128xbf16>, vector<128x128xf32> -> vector<128x128xf32>
    %c0_3 = arith.constant 0 : index
    %c0_4 = arith.constant 0 : index
    %4 = vector.load %arg3[%c0_3, %c0_4] : memref<1x128xf32, #tpu.memory_space<vmem>>, vector<1x128xf32>
    %5 = vector.broadcast %4 : vector<1x128xf32> to vector<128x128xf32>
    %6 = arith.addf %3, %5 : vector<128x128xf32>
    %cst_5 = arith.constant 0.000000e+00 : f32
    %7 = vector.broadcast %cst_5 : f32 to vector<128x128xf32>
    %8 = arith.cmpf ogt, %6, %7 : vector<128x128xf32>
    %cst_6 = arith.constant 0.00999999977 : f32
    %9 = vector.broadcast %cst_6 : f32 to vector<128x128xf32>
    %10 = arith.mulf %9, %6 : vector<128x128xf32>
    %11 = arith.select %8, %6, %10 : vector<128x128xi1>, vector<128x128xf32>
    %12 = arith.truncf %11 : vector<128x128xf32> to vector<128x128xbf16>
    %c0_7 = arith.constant 0 : index
    %c0_8 = arith.constant 0 : index
    %13 = vector.load %arg4[%c0_7, %c0_8] : memref<128x64xbf16, #tpu.memory_space<vmem>>, vector<128x64xbf16>
    %cst_9 = arith.constant dense<0.000000e+00> : vector<128x64xf32>
    %14 = tpu.matmul %12, %13, %cst_9 {dimension_numbers = #tpu.dot_dimension_numbers<[1], [0], [0], [1], [0, 0, 1, 1], [], []>} : vector<128x128xbf16>, vector<128x64xbf16>, vector<128x64xf32> -> vector<128x64xf32>
    %c0_10 = arith.constant 0 : index
    %c0_11 = arith.constant 0 : index
    %15 = vector.load %arg5[%c0_10, %c0_11] : memref<1x64xf32, #tpu.memory_space<vmem>>, vector<1x64xf32>
    %16 = vector.broadcast %15 : vector<1x64xf32> to vector<128x64xf32>
    %17 = arith.addf %14, %16 : vector<128x64xf32>
    %cst_12 = arith.constant 0.000000e+00 : f32
    %18 = vector.broadcast %cst_12 : f32 to vector<128x64xf32>
    %19 = arith.cmpf ogt, %17, %18 : vector<128x64xf32>
    %cst_13 = arith.constant 0.00999999977 : f32
    %20 = vector.broadcast %cst_13 : f32 to vector<128x64xf32>
    %21 = arith.mulf %20, %17 : vector<128x64xf32>
    %22 = arith.select %19, %17, %21 : vector<128x64xi1>, vector<128x64xf32>
    %23 = arith.truncf %22 : vector<128x64xf32> to vector<128x64xbf16>
    %c0_14 = arith.constant 0 : index
    %c0_15 = arith.constant 0 : index
    %24 = vector.load %arg6[%c0_14, %c0_15] : memref<64x128xbf16, #tpu.memory_space<vmem>>, vector<64x128xbf16>
    %cst_16 = arith.constant dense<0.000000e+00> : vector<128x128xf32>
    %25 = tpu.matmul %23, %24, %cst_16 {dimension_numbers = #tpu.dot_dimension_numbers<[1], [0], [0], [1], [0, 0, 1, 1], [], []>} : vector<128x64xbf16>, vector<64x128xbf16>, vector<128x128xf32> -> vector<128x128xf32>
    %c0_17 = arith.constant 0 : index
    %c0_18 = arith.constant 0 : index
    %26 = vector.load %arg7[%c0_17, %c0_18] : memref<1x128xf32, #tpu.memory_space<vmem>>, vector<1x128xf32>
    %27 = vector.broadcast %26 : vector<1x128xf32> to vector<128x128xf32>
    %28 = arith.addf %25, %27 : vector<128x128xf32>
    %c0_19 = arith.constant 0 : index
    %c0_20 = arith.constant 0 : index
    %29 = vector.load %arg8[%c0_19, %c0_20] : memref<128x128xf32, #tpu.memory_space<vmem>>, vector<128x128xf32>
    tpu.vector_store %arg8[%c0_19, %c0_20], %28 {strides = array<i32>} : memref<128x128xf32, #tpu.memory_space<vmem>>, vector<128x128xf32>,
    return
  }
  func.func @transform_0(%arg0: i32) -> (i32, i32) {
    %c0_i32 = arith.constant 0 : i32
    %c0_i32_0 = arith.constant 0 : i32
    return %arg0, %c0_i32 : i32, i32
  }
  func.func @transform_1(%arg0: i32) -> (i32, i32) {
    %c0_i32 = arith.constant 0 : i32
    %c0_i32_0 = arith.constant 0 : i32
    %c0_i32_1 = arith.constant 0 : i32
    return %c0_i32, %c0_i32_0 : i32, i32
  }
  func.func @transform_2(%arg0: i32) -> (i32, i32) {
    %c0_i32 = arith.constant 0 : i32
    %c0_i32_0 = arith.constant 0 : i32
    %c0_i32_1 = arith.constant 0 : i32
    return %c0_i32, %c0_i32_0 : i32, i32
  }
  func.func @transform_3(%arg0: i32) -> (i32, i32) {
    %c0_i32 = arith.constant 0 : i32
    %c0_i32_0 = arith.constant 0 : i32
    %c0_i32_1 = arith.constant 0 : i32
    return %c0_i32, %c0_i32_0 : i32, i32
  }
  func.func @transform_4(%arg0: i32) -> (i32, i32) {
    %c0_i32 = arith.constant 0 : i32
    %c0_i32_0 = arith.constant 0 : i32
    %c0_i32_1 = arith.constant 0 : i32
    return %c0_i32, %c0_i32_0 : i32, i32
  }
  func.func @transform_5(%arg0: i32) -> (i32, i32) {
    %c0_i32 = arith.constant 0 : i32
    %c0_i32_0 = arith.constant 0 : i32
    %c0_i32_1 = arith.constant 0 : i32
    return %c0_i32, %c0_i32_0 : i32, i32
  }
  func.func @transform_6(%arg0: i32) -> (i32, i32) {
    %c0_i32 = arith.constant 0 : i32
    %c0_i32_0 = arith.constant 0 : i32
    %c0_i32_1 = arith.constant 0 : i32
    return %c0_i32, %c0_i32_0 : i32, i32
  }
  func.func @transform_7(%arg0: i32) -> (i32, i32) {
    %c0_i32 = arith.constant 0 : i32
    %c0_i32_0 = arith.constant 0 : i32
    return %arg0, %c0_i32 : i32, i32
  }
}

</mosaic_0001>

<bundles_post_ra>
// kernel: shallow_nn_forward.1
= control target key start
LH: loop header
LB: loop body
LE: loop exit
PB: predicated region body
PF: predicated region fallthrough
CT: control target
= control target key end

     0   :  { %s2748_s1 = inlined_call_operand.vmem [shape: bf16[1024,128], index: 1, kind: input, shape index: {}]   ;;  %s2749_s0 = inlined_call_operand.vmem [shape: f32[128,1024], index: 0, kind: input, shape index: {}]   ;;  %s2750_s2 = inlined_call_operand.vmem [shape: f32[1,128], index: 2, kind: input, shape index: {}]   ;;  %s2751_s3 = inlined_call_operand.vmem [shape: bf16[128,64], index: 3, kind: input, shape index: {}]   ;;  %s2752_s5 = inlined_call_operand.vmem [shape: bf16[64,128], index: 5, kind: input, shape index: {}]   ;;  %s2753_s4 = inlined_call_operand.vmem [shape: f32[1,64], index: 4, kind: input, shape index: {}]   ;;  %s2754_s6 = inlined_call_operand.vmem [shape: f32[1,128], index: 6, kind: input, shape index: {}]   ;;  %s2755_s7 = inlined_call_operand.vmem [shape: f32[128,128], index: 7, kind: output, shape index: {}]  }
   0x1   :  { %v1805_v0 = vld [vmem:[%s2748_s1 + $0x38] sm:$0xff]  ;;  %v1804_v2 = vld [vmem:[%s2748_s1 + $0x30] sm:$0xff]  ;;  %v1803_v4 = vld [vmem:[%s2748_s1 + $0x28] sm:$0xff] }
   0x2   :  { %v1813_v1 = vld [vmem:[%s2748_s1 + $0x78] sm:$0xff]  ;;  %1874 = vmatpush.bf16.msra.mxu2 %v1805_v0  ;;  %v1812_v3 = vld [vmem:[%s2748_s1 + $0x70] sm:$0xff]  ;;  %735 = vmatpush.bf16.msra.mxu0 %v1805_v0  ;;  %v1811_v5 = vld [vmem:[%s2748_s1 + $0x68] sm:$0xff] }
   0x3   :  { %1882 = vmatpush.bf16.msra.mxu3 %v1813_v1  ;;  %784 = vmatpush.bf16.msra.mxu1 %v1813_v1  ;;  %v1802_v6 = vld [vmem:[%s2748_s1 + $0x20] sm:$0xff]  ;;  %v1801_v8 = vld [vmem:[%s2748_s1 + $0x18] sm:$0xff]  ;;  %v1800_v10 = vld [vmem:[%s2748_s1 + $0x10] sm:$0xff] }
   0x4   :  { %v1810_v7 = vld [vmem:[%s2748_s1 + $0x60] sm:$0xff]  ;;  %v1809_v9 = vld [vmem:[%s2748_s1 + $0x58] sm:$0xff]  ;;  %v1808_v11 = vld [vmem:[%s2748_s1 + $0x50] sm:$0xff] }
   0x5   :  { %v1799_v12 = vld [vmem:[%s2748_s1 + $0x8] sm:$0xff]  ;;  %v1798_v14 = vld [vmem:[%s2748_s1] sm:$0xff]  ;;  %v1821_v20 = vld [vmem:[%s2748_s1 + $0xb8] sm:$0xff] }
   0x6   :  { %1875 = vmatpush.bf16.msra.mxu2 %v1804_v2  ;;  %736 = vmatpush.bf16.msra.mxu0 %v1804_v2  ;;  %v1807_v13 = vld [vmem:[%s2748_s1 + $0x48] sm:$0xff]  ;;  %v1806_v15 = vld [vmem:[%s2748_s1 + $0x40] sm:$0xff]  ;;  %v1829_v21 = vld [vmem:[%s2748_s1 + $0xf8] sm:$0xff] }
   0x7   :  { %1883 = vmatpush.bf16.msra.mxu3 %v1812_v3  ;;  %785 = vmatpush.bf16.msra.mxu1 %v1812_v3  ;;  %v91_v16 = vld [vmem:[%s2749_s0 + $0x200] sm:$0xff]  ;;  %v92_v18 = vld [vmem:[%s2749_s0 + $0x208] sm:$0xff]  ;;  %v1820_v28 = vld [vmem:[%s2748_s1 + $0xb0] sm:$0xff] }
   0x8   :  { %v99_v17 = vld [vmem:[%s2749_s0 + $0x240] sm:$0xff]  ;;  %v100_v19 = vld [vmem:[%s2749_s0 + $0x248] sm:$0xff]  ;;  %v1828_v30 = vld [vmem:[%s2748_s1 + $0xf0] sm:$0xff] }
   0x9   :  { %v27_v22 = vld [vmem:[%s2749_s0] sm:$0xff]  ;;  %v187_v24 = vpack.c.bf16 %v99_v17, %v91_v16  ;;  %v188_v25 = vpack.c.bf16 %v100_v19, %v92_v18  ;;  %v28_v26 = vld [vmem:[%s2749_s0 + $0x8] sm:$0xff]  ;;  %v1837_v33 = vld [vmem:[%s2748_s1 + $0x138] sm:$0xff] }
   0xa   :  { %1876 = vmatpush.bf16.msra.mxu2 %v1803_v4  ;;  %737 = vmatpush.bf16.msra.mxu0 %v1803_v4  ;;  %v35_v23 = vld [vmem:[%s2749_s0 + $0x40] sm:$0xff]  ;;  %v36_v27 = vld [vmem:[%s2749_s0 + $0x48] sm:$0xff]  ;;  %v1845_v35 = vld [vmem:[%s2748_s1 + $0x178] sm:$0xff] }
   0xb   :  { %1884 = vmatpush.bf16.msra.mxu3 %v1811_v5  ;;  %786 = vmatpush.bf16.msra.mxu1 %v1811_v5  ;;  %v155_v29 = vpack.c.bf16 %v35_v23, %v27_v22  ;;  %v156_v31 = vpack.c.bf16 %v36_v27, %v28_v26  ;;  %v1819_v32 = vld [vmem:[%s2748_s1 + $0xa8] sm:$0xff]  ;;  %v1836_v36 = vld [vmem:[%s2748_s1 + $0x130] sm:$0xff]  ;;  %v1818_v37 = vld [vmem:[%s2748_s1 + $0xa0] sm:$0xff] }
   0xc   :  { %v1827_v34 = vld [vmem:[%s2748_s1 + $0xe8] sm:$0xff]  ;;  %v1826_v38 = vld [vmem:[%s2748_s1 + $0xe0] sm:$0xff]  ;;  %v1817_v43 = vld [vmem:[%s2748_s1 + $0x98] sm:$0xff] }
   0xd   :  { %v107_v39 = vld [vmem:[%s2749_s0 + $0x280] sm:$0xff]  ;;  %v108_v41 = vld [vmem:[%s2749_s0 + $0x288] sm:$0xff]  ;;  %v1825_v46 = vld [vmem:[%s2748_s1 + $0xd8] sm:$0xff] }
   0xe   :  { %1877 = vmatpush.bf16.msra.mxu2 %v1802_v6  ;;  %738 = vmatpush.bf16.msra.mxu0 %v1802_v6  ;;  %v115_v40 = vld [vmem:[%s2749_s0 + $0x2c0] sm:$0xff]  ;;  %v116_v42 = vld [vmem:[%s2749_s0 + $0x2c8] sm:$0xff]  ;;  %v1816_v52 = vld [vmem:[%s2748_s1 + $0x90] sm:$0xff] }
   0xf   :  { %1885 = vmatpush.bf16.msra.mxu3 %v1810_v7  ;;  %787 = vmatpush.bf16.msra.mxu1 %v1810_v7  ;;  %v43_v44 = vld [vmem:[%s2749_s0 + $0x80] sm:$0xff]  ;;  %v195_v47 = vpack.c.bf16 %v115_v40, %v107_v39  ;;  %v196_v48 = vpack.c.bf16 %v116_v42, %v108_v41  ;;  %v44_v49 = vld [vmem:[%s2749_s0 + $0x88] sm:$0xff]  ;;  %v1824_v54 = vld [vmem:[%s2748_s1 + $0xd0] sm:$0xff] }
  0x10   :  { %v51_v45 = vld [vmem:[%s2749_s0 + $0xc0] sm:$0xff]  ;;  %v52_v50 = vld [vmem:[%s2749_s0 + $0xc8] sm:$0xff]  ;;  %v1844_v55 = vld [vmem:[%s2748_s1 + $0x170] sm:$0xff] }
  0x11   :  { %v163_v51 = vpack.c.bf16 %v51_v45, %v43_v44  ;;  %v164_v53 = vpack.c.bf16 %v52_v50, %v44_v49  ;;  %v1835_v56 = vld [vmem:[%s2748_s1 + $0x128] sm:$0xff]  ;;  %v1834_v60 = vld [vmem:[%s2748_s1 + $0x120] sm:$0xff]  ;;  %v1833_v2 = vld [vmem:[%s2748_s1 + $0x118] sm:$0xff] }
  0x12   :  { %1878 = vmatpush.bf16.msra.mxu2 %v1801_v8  ;;  %739 = vmatpush.bf16.msra.mxu0 %v1801_v8  ;;  %v1843_v57 = vld [vmem:[%s2748_s1 + $0x168] sm:$0xff]  ;;  %v1842_v61 = vld [vmem:[%s2748_s1 + $0x160] sm:$0xff]  ;;  %v1841_v5 = vld [vmem:[%s2748_s1 + $0x158] sm:$0xff] }
  0x13   :  { %1886 = vmatpush.bf16.msra.mxu3 %v1809_v9  ;;  %788 = vmatpush.bf16.msra.mxu1 %v1809_v9  ;;  %v1815_v58 = vld [vmem:[%s2748_s1 + $0x88] sm:$0xff]  ;;  %v1814_v62 = vld [vmem:[%s2748_s1 + $0x80] sm:$0xff]  ;;  %v1853_v16 = vld [vmem:[%s2748_s1 + $0x1b8] sm:$0xff] }
  0x14   :  { %v1823_v59 = vld [vmem:[%s2748_s1 + $0xc8] sm:$0xff]  ;;  %v1822_v63 = vld [vmem:[%s2748_s1 + $0xc0] sm:$0xff]  ;;  %v1861_v17 = vld [vmem:[%s2748_s1 + $0x1f8] sm:$0xff] }
  0x15   :  { %v123_v0 = vld [vmem:[%s2749_s0 + $0x300] sm:$0xff]  ;;  %v124_v3 = vld [vmem:[%s2749_s0 + $0x308] sm:$0xff]  ;;  %v38_v39 = vld [vmem:[%s2749_s0 + $0x58] sm:$0xff] }
  0x16   :  { %1879 = vmatpush.bf16.msra.mxu2 %v1800_v10  ;;  %740 = vmatpush.bf16.msra.mxu0 %v1800_v10  ;;  %v131_v1 = vld [vmem:[%s2749_s0 + $0x340] sm:$0xff]  ;;  %v132_v4 = vld [vmem:[%s2749_s0 + $0x348] sm:$0xff]  ;;  %v45_v50 = vld [vmem:[%s2749_s0 + $0x90] sm:$0xff] }
  0x17   :  { %1887 = vmatpush.bf16.msra.mxu3 %v1808_v11  ;;  %789 = vmatpush.bf16.msra.mxu1 %v1808_v11  ;;  %v59_v6 = vld [vmem:[%s2749_s0 + $0x100] sm:$0xff]  ;;  %v203_v8 = vpack.c.bf16 %v131_v1, %v123_v0  ;;  %v204_v9 = vpack.c.bf16 %v132_v4, %v124_v3  ;;  %v60_v10 = vld [vmem:[%s2749_s0 + $0x108] sm:$0xff]  ;;  %v61_v0 = vld [vmem:[%s2749_s0 + $0x110] sm:$0xff] }
  0x18   :  { %v67_v7 = vld [vmem:[%s2749_s0 + $0x140] sm:$0xff]  ;;  %v68_v11 = vld [vmem:[%s2749_s0 + $0x148] sm:$0xff]  ;;  %v69_v1 = vld [vmem:[%s2749_s0 + $0x150] sm:$0xff] }
  0x19   :  { %v1831_v18 = vld [vmem:[%s2748_s1 + $0x108] sm:$0xff]  ;;  %v139_v22 = vld [vmem:[%s2749_s0 + $0x380] sm:$0xff]  ;;  %v70_v3 = vld [vmem:[%s2749_s0 + $0x158] sm:$0xff] }
  0x1a   :  { %1880 = vmatpush.bf16.msra.mxu2 %v1799_v12  ;;  %741 = vmatpush.bf16.msra.mxu0 %v1799_v12  ;;  %v1832_v12 = vld [vmem:[%s2748_s1 + $0x110] sm:$0xff]  ;;  %v1839_v19 = vld [vmem:[%s2748_s1 + $0x148] sm:$0xff]  ;;  %v147_v23 = vld [vmem:[%s2749_s0 + $0x3c0] sm:$0xff] }
  0x1b   :  { %1888 = vmatpush.bf16.msra.mxu3 %v1807_v13  ;;  %790 = vmatpush.bf16.msra.mxu1 %v1807_v13  ;;  %v171_v13 = vpack.c.bf16 %v67_v7, %v59_v6  ;;  %v75_v26 = vld [vmem:[%s2749_s0 + $0x180] sm:$0xff]  ;;  %v32_v44 = vld [vmem:[%s2749_s0 + $0x28] sm:$0xff]  ;;  %v173_v6 = vpack.c.bf16 %v69_v1, %v61_v0 }
  0x1c   :  { %v83_v27 = vld [vmem:[%s2749_s0 + $0x1c0] sm:$0xff]  ;;  %v40_v45 = vld [vmem:[%s2749_s0 + $0x68] sm:$0xff] }
  0x1d   :  { %v31_v40 = vld [vmem:[%s2749_s0 + $0x20] sm:$0xff]  ;;  %v1859_v49 = vld [vmem:[%s2748_s1 + $0x1e8] sm:$0xff] }
  0x1e   :  { %1881 = vmatpush.bf16.msra.mxu2 %v1798_v14  ;;  %742 = vmatpush.bf16.msra.mxu0 %v1798_v14  ;;  %v172_v14 = vpack.c.bf16 %v68_v11, %v60_v10  ;;  %v39_v41 = vld [vmem:[%s2749_s0 + $0x60] sm:$0xff]  ;;  %v112_v0 = vld [vmem:[%s2749_s0 + $0x2a8] sm:$0xff] }
  0x1f   :  { %1889 = vmatpush.bf16.msra.mxu3 %v1806_v15  ;;  %791 = vmatpush.bf16.msra.mxu1 %v1806_v15  ;;  %v1840_v15 = vld [vmem:[%s2748_s1 + $0x150] sm:$0xff]  ;;  %v63_v4 = vld [vmem:[%s2749_s0 + $0x120] sm:$0xff]  ;;  %v120_v1 = vld [vmem:[%s2749_s0 + $0x2e8] sm:$0xff] }
  0x21   :  { %763 = vmatmul.bf16.vlgmr.msra.gmra.mxu2 %v187_v24  ;;  %743 = vmatmul.bf16.vlgmr.msra.gmra.mxu0 %v155_v29  ;;  %v140_v24 = vld [vmem:[%s2749_s0 + $0x388] sm:$0xff] }
  0x22   :  { %833 = vmatpush.bf16.msrb.mxu2 %v1821_v20  ;;  %812 = vmatmul.bf16.vlgmr.msra.gmra.mxu3 %v188_v25  ;;  %v1830_v20 = vld [vmem:[%s2748_s1 + $0x100] sm:$0xff]  ;;  %v148_v25 = vld [vmem:[%s2749_s0 + $0x3c8] sm:$0xff] }
  0x23   :  { %882 = vmatpush.bf16.msrb.mxu3 %v1829_v21  ;;  %792 = vmatmul.bf16.vlgmr.msra.gmra.mxu1 %v156_v31  ;;  %v1838_v21 = vld [vmem:[%s2748_s1 + $0x140] sm:$0xff]  ;;  %v212_v29 = vpack.c.bf16 %v148_v25, %v140_v24  ;;  %v84_v31 = vld [vmem:[%s2749_s0 + $0x1c8] sm:$0xff] }
  0x24   :  { %931 = vmatpush.bf16.msrb.mxu0 %v1837_v33  ;;  %980 = vmatpush.bf16.msrb.mxu1 %v1845_v35  ;;  %v1860_v35 = vld [vmem:[%s2748_s1 + $0x1f0] sm:$0xff] }
  0x26   :  { %834 = vmatpush.bf16.msrb.mxu2 %v1820_v28  ;;  %v211_v28 = vpack.c.bf16 %v147_v23, %v139_v22  ;;  %v80_v22 = vld [vmem:[%s2749_s0 + $0x1a8] sm:$0xff] }
  0x27   :  { %883 = vmatpush.bf16.msrb.mxu3 %v1828_v30  ;;  %v76_v30 = vld [vmem:[%s2749_s0 + $0x188] sm:$0xff] }
  0x28   :  { %932 = vmatpush.bf16.msrb.mxu0 %v1836_v36  ;;  %981 = vmatpush.bf16.msrb.mxu1 %v1844_v55  ;;  %v180_v33 = vpack.c.bf16 %v84_v31, %v76_v30  ;;  %v29_v36 = vld [vmem:[%s2749_s0 + $0x10] sm:$0xff]  ;;  %v55_v55 = vld [vmem:[%s2749_s0 + $0xe0] sm:$0xff]  ;;  %v88_v23 = vld [vmem:[%s2749_s0 + $0x1e8] sm:$0xff] }
  0x29   :  { %v184_v25 = vpack.c.bf16 %v88_v23, %v80_v22  ;;  %v94_v30 = vld [vmem:[%s2749_s0 + $0x218] sm:$0xff]  ;;  %v127_v23 = vld [vmem:[%s2749_s0 + $0x320] sm:$0xff] }
  0x2a   :  { %835 = vmatpush.bf16.msrb.mxu2 %v1819_v32  ;;  %v179_v32 = vpack.c.bf16 %v83_v27, %v75_v26  ;;  %v1848_v26 = vld [vmem:[%s2748_s1 + $0x190] sm:$0xff]  ;;  %v102_v31 = vld [vmem:[%s2749_s0 + $0x258] sm:$0xff] }
  0x2b   :  { %884 = vmatpush.bf16.msrb.mxu3 %v1827_v34  ;;  %v1852_v34 = vld [vmem:[%s2748_s1 + $0x1b0] sm:$0xff] }
  0x2c   :  { %933 = vmatpush.bf16.msrb.mxu0 %v1835_v56  ;;  %982 = vmatpush.bf16.msrb.mxu1 %v1843_v57  ;;  %v1856_v27 = vld [vmem:[%s2748_s1 + $0x1d0] sm:$0xff] }
  0x2e   :  { %836 = vmatpush.bf16.msrb.mxu2 %v1818_v37  ;;  %v37_v37 = vld [vmem:[%s2749_s0 + $0x50] sm:$0xff] }
  0x2f   :  { %885 = vmatpush.bf16.msrb.mxu3 %v1826_v38  ;;  %v30_v38 = vld [vmem:[%s2749_s0 + $0x18] sm:$0xff]  ;;  %v157_v42 = vpack.c.bf16 %v37_v37, %v29_v36  ;;  %v96_v36 = vld [vmem:[%s2749_s0 + $0x228] sm:$0xff] }
  0x30   :  { %934 = vmatpush.bf16.msrb.mxu0 %v1834_v60  ;;  %983 = vmatpush.bf16.msrb.mxu1 %v1842_v61  ;;  %v104_v37 = vld [vmem:[%s2749_s0 + $0x268] sm:$0xff] }
  0x31   :  { %768 = vmatmul.bf16.gmra.mxu2 %v195_v47  ;;  %748 = vmatmul.bf16.gmra.mxu0 %v163_v51  ;;  %v160_v47 = vpack.c.bf16 %v40_v45, %v32_v44  ;;  %v53_v51 = vld [vmem:[%s2749_s0 + $0xd0] sm:$0xff]  ;;  %v1847_v44 = vld [vmem:[%s2748_s1 + $0x188] sm:$0xff] }
  0x32   :  { %837 = vmatpush.bf16.msrb.mxu2 %v1817_v43  ;;  %817 = vmatmul.bf16.gmra.mxu3 %v196_v48  ;;  %v158_v43 = vpack.c.bf16 %v38_v39, %v30_v38  ;;  %v1851_v48 = vld [vmem:[%s2748_s1 + $0x1a8] sm:$0xff]  ;;  %v165_v56 = vpack.c.bf16 %v53_v51, %v45_v50  ;;  %v2332_v38 = vld [vmem:[%s2750_s2] ss:$0 sm:$0xff] }
  0x33   :  { %886 = vmatpush.bf16.msrb.mxu3 %v1825_v46  ;;  %797 = vmatmul.bf16.gmra.mxu1 %v164_v53  ;;  %v159_v46 = vpack.c.bf16 %v39_v41, %v31_v40  ;;  %v54_v53 = vld [vmem:[%s2749_s0 + $0xd8] sm:$0xff]  ;;  %v192_v41 = vpack.c.bf16 %v104_v37, %v96_v36  ;;  %v1855_v45 = vld [vmem:[%s2748_s1 + $0x1c8] sm:$0xff] }
  0x34   :  { %935 = vmatpush.bf16.msrb.mxu0 %v1833_v2  ;;  %984 = vmatpush.bf16.msrb.mxu1 %v1841_v5  ;;  %v62_v2 = vld [vmem:[%s2749_s0 + $0x118] sm:$0xff]  ;;  %v71_v5 = vld [vmem:[%s2749_s0 + $0x160] sm:$0xff] }
  0x35   :  { %v174_v7 = vpack.c.bf16 %v70_v3, %v62_v2  ;;  %v175_v10 = vpack.c.bf16 %v71_v5, %v63_v4  ;;  %v200_v5 = vpack.c.bf16 %v120_v1, %v112_v0 }
  0x36   :  { %838 = vmatpush.bf16.msrb.mxu2 %v1816_v52  ;;  %v46_v52 = vld [vmem:[%s2749_s0 + $0x98] sm:$0xff] }
  0x37   :  { %887 = vmatpush.bf16.msrb.mxu3 %v1824_v54  ;;  %v47_v54 = vld [vmem:[%s2749_s0 + $0xa0] sm:$0xff]  ;;  %v166_v57 = vpack.c.bf16 %v54_v53, %v46_v52  ;;  %v109_v52 = vld [vmem:[%s2749_s0 + $0x290] sm:$0xff] }
  0x38   :  { %936 = vmatpush.bf16.msrb.mxu0 %v1832_v12  ;;  %985 = vmatpush.bf16.msrb.mxu1 %v1840_v15  ;;  %v167_v60 = vpack.c.bf16 %v55_v55, %v47_v54  ;;  %v1849_v12 = vld [vmem:[%s2748_s1 + $0x198] sm:$0xff]  ;;  %v85_v15 = vld [vmem:[%s2749_s0 + $0x1d0] sm:$0xff] }
  0x39   :  { %v117_v54 = vld [vmem:[%s2749_s0 + $0x2d0] sm:$0xff]  ;;  %v110_v55 = vld [vmem:[%s2749_s0 + $0x298] sm:$0xff] }
  0x3a   :  { %839 = vmatpush.bf16.msrb.mxu2 %v1815_v58  ;;  %v48_v58 = vld [vmem:[%s2749_s0 + $0xa8] sm:$0xff] }
  0x3b   :  { %888 = vmatpush.bf16.msrb.mxu3 %v1823_v59  ;;  %v56_v59 = vld [vmem:[%s2749_s0 + $0xe8] sm:$0xff] }
  0x3c   :  { %937 = vmatpush.bf16.msrb.mxu0 %v1831_v18  ;;  %986 = vmatpush.bf16.msrb.mxu1 %v1839_v19  ;;  %v168_v61 = vpack.c.bf16 %v56_v59, %v48_v58  ;;  %v79_v18 = vld [vmem:[%s2749_s0 + $0x1a0] sm:$0xff] }
  0x3d   :  { %v87_v19 = vld [vmem:[%s2749_s0 + $0x1e0] sm:$0xff] }
  0x3e   :  { %840 = vmatpush.bf16.msrb.mxu2 %v1814_v62  ;;  %v1850_v62 = vld [vmem:[%s2748_s1 + $0x1a0] sm:$0xff]  ;;  %v183_v24 = vpack.c.bf16 %v87_v19, %v79_v18  ;;  %v133_v18 = vld [vmem:[%s2749_s0 + $0x350] sm:$0xff]  ;;  %v126_v19 = vld [vmem:[%s2749_s0 + $0x318] sm:$0xff] }
  0x3f   :  { %889 = vmatpush.bf16.msrb.mxu3 %v1822_v63  ;;  %v1858_v63 = vld [vmem:[%s2748_s1 + $0x1e0] sm:$0xff] }
  0x40   :  { %938 = vmatpush.bf16.msrb.mxu0 %v1830_v20  ;;  %987 = vmatpush.bf16.msrb.mxu1 %v1838_v21  ;;  %v111_v59 = vld [vmem:[%s2749_s0 + $0x2a0] sm:$0xff] }
  0x41   :  { %773 = vmatmul.bf16.gmra.mxu2 %v203_v8  ;;  %753 = vmatmul.bf16.gmra.mxu0 %v171_v13  ;;  %v64_v8 = vld [vmem:[%s2749_s0 + $0x128] sm:$0xff]  ;;  %v1857_v13 = vld [vmem:[%s2748_s1 + $0x1d8] sm:$0xff] }
  0x42   :  { %822 = vmatmul.bf16.gmra.mxu3 %v204_v9  ;;  %1029 = vmatpush.bf16.msra.mxu2 %v1853_v16  ;;  %v72_v9 = vld [vmem:[%s2749_s0 + $0x168] sm:$0xff]  ;;  %v78_v16 = vld [vmem:[%s2749_s0 + $0x198] sm:$0xff] }
  0x43   :  { %802 = vmatmul.bf16.gmra.mxu1 %v172_v14  ;;  %1078 = vmatpush.bf16.msra.mxu3 %v1861_v17  ;;  %v176_v11 = vpack.c.bf16 %v72_v9, %v64_v8  ;;  %v77_v14 = vld [vmem:[%s2749_s0 + $0x190] sm:$0xff]  ;;  %v86_v17 = vld [vmem:[%s2749_s0 + $0x1d8] sm:$0xff]  ;;  %v1846_v8 = vld [vmem:[%s2748_s1 + $0x180] sm:$0xff] }
  0x44   :  { %v181_v20 = vpack.c.bf16 %v85_v15, %v77_v14  ;;  %v182_v21 = vpack.c.bf16 %v86_v17, %v78_v16  ;;  %v1854_v9 = vld [vmem:[%s2748_s1 + $0x1c0] sm:$0xff]  ;;  %v125_v16 = vld [vmem:[%s2749_s0 + $0x310] sm:$0xff] }
  0x46   :  { %1030 = vmatpush.bf16.msra.mxu2 %v1852_v34 }
  0x47   :  { %1079 = vmatpush.bf16.msra.mxu3 %v1860_v35  ;;  %v190_v35 = vpack.c.bf16 %v102_v31, %v94_v30 }
  0x4a   :  { %1031 = vmatpush.bf16.msra.mxu2 %v1851_v48 }
  0x4b   :  { %1080 = vmatpush.bf16.msra.mxu3 %v1859_v49 }
  0x4e   :  { %1032 = vmatpush.bf16.msra.mxu2 %v1850_v62  ;;  %v197_v62 = vpack.c.bf16 %v117_v54, %v109_v52  ;;  %v143_v54 = vld [vmem:[%s2749_s0 + $0x3a0] sm:$0xff] }
  0x4f   :  { %1081 = vmatpush.bf16.msra.mxu3 %v1858_v63 }
  0x51   :  { %778 = vmatmul.bf16.gmra.mxu2 %v211_v28  ;;  %758 = vmatmul.bf16.gmra.mxu0 %v179_v32  ;;  %v93_v28 = vld [vmem:[%s2749_s0 + $0x210] sm:$0xff]  ;;  %v95_v32 = vld [vmem:[%s2749_s0 + $0x220] sm:$0xff] }
  0x52   :  { %827 = vmatmul.bf16.gmra.mxu3 %v212_v29  ;;  %1033 = vmatpush.bf16.msra.mxu2 %v1849_v12  ;;  %v101_v29 = vld [vmem:[%s2749_s0 + $0x250] sm:$0xff] }
  0x53   :  { %807 = vmatmul.bf16.gmra.mxu1 %v180_v33  ;;  %1082 = vmatpush.bf16.msra.mxu3 %v1857_v13  ;;  %v103_v33 = vld [vmem:[%s2749_s0 + $0x260] sm:$0xff]  ;;  %v189_v34 = vpack.c.bf16 %v101_v29, %v93_v28  ;;  %v128_v28 = vld [vmem:[%s2749_s0 + $0x328] sm:$0xff] }
  0x54   :  { %v191_v39 = vpack.c.bf16 %v103_v33, %v95_v32  ;;  %v136_v29 = vld [vmem:[%s2749_s0 + $0x368] sm:$0xff] }
  0x55   :  { %v208_v33 = vpack.c.bf16 %v136_v29, %v128_v28  ;;  %v1868_v29 = vld [vmem:[%s2751_s3 + $0x30] sm:$0xff] }
  0x56   :  { %1034 = vmatpush.bf16.msra.mxu2 %v1848_v26  ;;  %v205_v26 = vpack.c.bf16 %v133_v18, %v125_v16  ;;  %v42_v16 = vld [vmem:[%s2749_s0 + $0x78] sm:$0xff] }
  0x57   :  { %1083 = vmatpush.bf16.msra.mxu3 %v1856_v27 }
  0x5a   :  { %1035 = vmatpush.bf16.msra.mxu2 %v1847_v44 }
  0x5b   :  { %1084 = vmatpush.bf16.msra.mxu3 %v1855_v45  ;;  %v149_v45 = vld [vmem:[%s2749_s0 + $0x3d0] sm:$0xff] }
  0x5e   :  { %1036 = vmatpush.bf16.msra.mxu2 %v1846_v8 }
  0x5f   :  { %1085 = vmatpush.bf16.msra.mxu3 %v1854_v9  ;;  %v1869_v9 = vld [vmem:[%s2751_s3 + $0x38] sm:$0xff] }
  0x60   :  { %1251 = vmatpush.bf16.msra.mxu0 %v1869_v9  ;;  %v81_v9 = vld [vmem:[%s2749_s0 + $0x1b0] sm:$0xff] }
  0x61   :  { %841 = vmatmul.bf16.vlgmr.msrb.gmra.mxu2 %v157_v42  ;;  %939 = vmatmul.bf16.vlgmr.msrb.gmra.mxu0 %v159_v46 }
  0x62   :  { %890 = vmatmul.bf16.vlgmr.msrb.gmra.mxu3 %v158_v43 }
  0x63   :  { %988 = vmatmul.bf16.vlgmr.msrb.gmra.mxu1 %v160_v47 }
  0x64   :  { %1252 = vmatpush.bf16.msra.mxu0 %v1868_v29 }
  0x71   :  { %846 = vmatmul.bf16.gmra.mxu2 %v165_v56  ;;  %944 = vmatmul.bf16.gmra.mxu0 %v167_v60  ;;  %v118_v56 = vld [vmem:[%s2749_s0 + $0x2d8] sm:$0xff]  ;;  %v119_v60 = vld [vmem:[%s2749_s0 + $0x2e0] sm:$0xff] }
  0x72   :  { %895 = vmatmul.bf16.gmra.mxu3 %v166_v57  ;;  %v198_v63 = vpack.c.bf16 %v118_v56, %v110_v55  ;;  %v199_v3 = vpack.c.bf16 %v119_v60, %v111_v59  ;;  %v151_v55 = vld [vmem:[%s2749_s0 + $0x3e0] sm:$0xff]  ;;  %v144_v59 = vld [vmem:[%s2749_s0 + $0x3a8] sm:$0xff] }
  0x73   :  { %993 = vmatmul.bf16.gmra.mxu1 %v168_v61  ;;  %v152_v60 = vld [vmem:[%s2749_s0 + $0x3e8] sm:$0xff] }
  0x74   :  { %v216_v0 = vpack.c.bf16 %v152_v60, %v144_v59 }
  0x81   :  { %851 = vmatmul.bf16.gmra.mxu2 %v173_v6  ;;  %949 = vmatmul.bf16.gmra.mxu0 %v175_v10 }
  0x82   :  { %900 = vmatmul.bf16.gmra.mxu3 %v174_v7 }
  0x83   :  { %998 = vmatmul.bf16.gmra.mxu1 %v176_v11 }
  0x91   :  { %856 = vmatmul.bf16.gmra.mxu2 %v181_v20  ;;  %954 = vmatmul.bf16.gmra.mxu0 %v183_v24  ;;  %v134_v20 = vld [vmem:[%s2749_s0 + $0x358] sm:$0xff]  ;;  %v135_v24 = vld [vmem:[%s2749_s0 + $0x360] sm:$0xff] }
  0x92   :  { %905 = vmatmul.bf16.gmra.mxu3 %v182_v21  ;;  %v206_v27 = vpack.c.bf16 %v134_v20, %v126_v19  ;;  %v207_v31 = vpack.c.bf16 %v135_v24, %v127_v23 }
  0x93   :  { %1003 = vmatmul.bf16.gmra.mxu1 %v184_v25 }
  0x9e   :  { %v744_v40 = vpop.f32.mrf.mxu0 }
  0x9f   :  { %v745_v42 = vadd.f32 %v2332_v38, %v744_v40 }
  0xa0   :  { %v793_v43 = vpop.f32.mrf.mxu1 }
  0xa1   :  { %861 = vmatmul.bf16.gmra.mxu2 %v189_v34  ;;  %v2341_v46 = vadd.f32 %v793_v43, %v745_v42  ;;  %959 = vmatmul.bf16.gmra.mxu0 %v191_v39  ;;  %v141_v43 = vld [vmem:[%s2749_s0 + $0x390] sm:$0xff] }
  0xa2   :  { %910 = vmatmul.bf16.gmra.mxu3 %v190_v35 }
  0xa3   :  { %1008 = vmatmul.bf16.gmra.mxu1 %v192_v41 }
  0xa4   :  { %v764_v47 = vpop.f32.mrf.mxu2 }
  0xa5   :  { %v813_v48 = vpop.f32.mrf.mxu3  ;;  %v765_v49 = vadd.f32 %v2332_v38, %v764_v47  ;;  %v142_v47 = vld [vmem:[%s2749_s0 + $0x398] sm:$0xff] }
  0xa6   :  { %v2346_v51 = vpop.f32.mrf.mxu0 }
  0xa7   :  { %v2344_v50 = vadd.f32 %v813_v48, %v765_v49  ;;  %v150_v48 = vld [vmem:[%s2749_s0 + $0x3d8] sm:$0xff] }
  0xa8   :  { %v2351_v53 = vpop.f32.mrf.mxu1 }
  0xac   :  { %v766_v57 = vpop.f32.mrf.mxu2 }
  0xad   :  { %v815_v58 = vpop.f32.mrf.mxu3  ;;  %v767_v61 = vadd.f32 %v2332_v38, %v766_v57  ;;  %v213_v57 = vpack.c.bf16 %v149_v45, %v141_v43 }
  0xae   :  { %v749_v4 = vpop.f32.mrf.mxu0 }
  0xaf   :  { %v2375_v2 = vadd.f32 %v815_v58, %v767_v61  ;;  %v750_v6 = vadd.f32 %v2332_v38, %v749_v4  ;;  %v214_v58 = vpack.c.bf16 %v150_v48, %v142_v47 }
  0xb0   :  { %v798_v7 = vpop.f32.mrf.mxu1 }
  0xb1   :  { %866 = vmatmul.bf16.gmra.mxu2 %v197_v62  ;;  %v2384_v10 = vadd.f32 %v798_v7, %v750_v6  ;;  %964 = vmatmul.bf16.gmra.mxu0 %v199_v3  ;;  %v215_v62 = vpack.c.bf16 %v151_v55, %v143_v54  ;;  %v65_v55 = vld [vmem:[%s2749_s0 + $0x130] sm:$0xff] }
  0xb2   :  { %915 = vmatmul.bf16.gmra.mxu3 %v198_v63 }
  0xb3   :  { %1013 = vmatmul.bf16.gmra.mxu1 %v200_v5 }
  0xb4   :  { %v769_v11 = vpop.f32.mrf.mxu2 }
  0xb5   :  { %v818_v12 = vpop.f32.mrf.mxu3  ;;  %v770_v13 = vadd.f32 %v2332_v38, %v769_v11  ;;  %v33_v11 = vld [vmem:[%s2749_s0 + $0x30] sm:$0xff] }
  0xb6   :  { %v2389_v15 = vpop.f32.mrf.mxu0 }
  0xb7   :  { %v2387_v14 = vadd.f32 %v818_v12, %v770_v13  ;;  %v41_v12 = vld [vmem:[%s2749_s0 + $0x70] sm:$0xff]  ;;  %v34_v13 = vld [vmem:[%s2749_s0 + $0x38] sm:$0xff]  ;;  %v752_v47 = vadd.f32 %v2332_v38, %v2389_v15 }
  0xb8   :  { %v2394_v17 = vpop.f32.mrf.mxu1  ;;  %v74_v15 = vld [vmem:[%s2749_s0 + $0x178] sm:$0xff] }
  0xb9   :  { %v801_v54 = vadd.f32 %v2394_v17, %v752_v47 }
  0xbc   :  { %v771_v21 = vpop.f32.mrf.mxu2 }
  0xbd   :  { %v820_v22 = vpop.f32.mrf.mxu3  ;;  %v772_v25 = vadd.f32 %v2332_v38, %v771_v21  ;;  %v161_v21 = vpack.c.bf16 %v41_v12, %v33_v11  ;;  %v89_v11 = vld [vmem:[%s2749_s0 + $0x1f0] sm:$0xff] }
  0xbe   :  { %v754_v32 = vpop.f32.mrf.mxu0 }
  0xbf   :  { %v2418_v30 = vadd.f32 %v820_v22, %v772_v25  ;;  %v755_v34 = vadd.f32 %v2332_v38, %v754_v32  ;;  %v162_v22 = vpack.c.bf16 %v42_v16, %v34_v13  ;;  %v49_v32 = vld [vmem:[%s2749_s0 + $0xb0] sm:$0xff]  ;;  %v185_v16 = vpack.c.bf16 %v89_v11, %v81_v9 }
  0xc0   :  { %v803_v35 = vpop.f32.mrf.mxu1 }
  0xc1   :  { %871 = vmatmul.bf16.gmra.mxu2 %v205_v26  ;;  %v2421_v36 = vadd.f32 %v803_v35, %v755_v34  ;;  %969 = vmatmul.bf16.gmra.mxu0 %v207_v31  ;;  %v747_v26 = vadd.f32 %v2332_v38, %v2346_v51  ;;  %v58_v51 = vld [vmem:[%s2749_s0 + $0xf8] sm:$0xff] }
  0xc2   :  { %920 = vmatmul.bf16.gmra.mxu3 %v206_v27 }
  0xc3   :  { %1018 = vmatmul.bf16.gmra.mxu1 %v208_v33  ;;  %v796_v31 = vadd.f32 %v2351_v53, %v747_v26  ;;  %v57_v33 = vld [vmem:[%s2749_s0 + $0xf0] sm:$0xff] }
  0xc4   :  { %v774_v37 = vpop.f32.mrf.mxu2 }
  0xc5   :  { %v823_v39 = vpop.f32.mrf.mxu3  ;;  %v775_v40 = vadd.f32 %v2332_v38, %v774_v37  ;;  %v169_v37 = vpack.c.bf16 %v57_v33, %v49_v32  ;;  %v97_v32 = vld [vmem:[%s2749_s0 + $0x230] sm:$0xff] }
  0xc6   :  { %v2426_v42 = vpop.f32.mrf.mxu0  ;;  %v105_v33 = vld [vmem:[%s2749_s0 + $0x270] sm:$0xff] }
  0xc7   :  { %v2424_v41 = vadd.f32 %v823_v39, %v775_v40 }
  0xc8   :  { %v2431_v44 = vpop.f32.mrf.mxu1 }
  0xcc   :  { %v776_v49 = vpop.f32.mrf.mxu2 }
  0xcd   :  { %v825_v52 = vpop.f32.mrf.mxu3  ;;  %v777_v56 = vadd.f32 %v2332_v38, %v776_v49 }
  0xce   :  { %v759_v63 = vpop.f32.mrf.mxu0 }
  0xcf   :  { %v2455_v61 = vadd.f32 %v825_v52, %v777_v56  ;;  %v760_v1 = vadd.f32 %v2332_v38, %v759_v63  ;;  %v1867_v52 = vld [vmem:[%s2751_s3 + $0x28] sm:$0xff]  ;;  %v73_v56 = vld [vmem:[%s2749_s0 + $0x170] sm:$0xff] }
  0xd0   :  { %v808_v3 = vpop.f32.mrf.mxu1  ;;  %1253 = vmatpush.bf16.msra.mxu0 %v1867_v52  ;;  %v177_v59 = vpack.c.bf16 %v73_v56, %v65_v55  ;;  %v113_v52 = vld [vmem:[%s2749_s0 + $0x2b0] sm:$0xff]  ;;  %v114_v55 = vld [vmem:[%s2749_s0 + $0x2b8] sm:$0xff] }
  0xd1   :  { %876 = vmatmul.bf16.gmra.mxu2 %v213_v57  ;;  %v2458_v4 = vadd.f32 %v808_v3, %v760_v1  ;;  %974 = vmatmul.bf16.gmra.mxu0 %v215_v62  ;;  %v757_v1 = vadd.f32 %v2332_v38, %v2426_v42  ;;  %v90_v42 = vld [vmem:[%s2749_s0 + $0x1f8] sm:$0xff] }
  0xd2   :  { %925 = vmatmul.bf16.gmra.mxu3 %v214_v58 }
  0xd3   :  { %1023 = vmatmul.bf16.gmra.mxu1 %v216_v0 }
  0xd4   :  { %v779_v5 = vpop.f32.mrf.mxu2 }
  0xd5   :  { %v828_v6 = vpop.f32.mrf.mxu3  ;;  %v780_v7 = vadd.f32 %v2332_v38, %v779_v5 }
  0xd7   :  { %v2461_v8 = vadd.f32 %v828_v6, %v780_v7  ;;  %v1866_v6 = vld [vmem:[%s2751_s3 + $0x20] sm:$0xff]  ;;  %v806_v7 = vadd.f32 %v2431_v44, %v757_v1  ;;  %v1863_v1 = vld [vmem:[%s2751_s3 + $0x8] sm:$0xff] }
  0xd8   :  { %1254 = vmatpush.bf16.msra.mxu0 %v1866_v6  ;;  %v810_v29 = vpop.f32.mrf.mxu1  ;;  %v130_v6 = vld [vmem:[%s2749_s0 + $0x338] sm:$0xff] }
  0xdc   :  { %v781_v18 = vpop.f32.mrf.mxu2 }
  0xdd   :  { %v830_v19 = vpop.f32.mrf.mxu3  ;;  %v782_v20 = vadd.f32 %v2332_v38, %v781_v18 }
  0xdf   :  { %v2479_v23 = vadd.f32 %v830_v19, %v782_v20  ;;  %v761_v20 = vpop.f32.mrf.mxu0 }
  0xe1   :  { %1037 = vmatmul.bf16.vlgmr.msra.gmra.mxu2 %v161_v21 }
  0xe2   :  { %1086 = vmatmul.bf16.vlgmr.msra.gmra.mxu3 %v162_v22 }
  0xe4   :  { %v842_v24 = vpop.f32.mrf.mxu2 }
  0xe5   :  { %v891_v25 = vpop.f32.mrf.mxu3  ;;  %v843_v27 = vadd.f32 %v842_v24, %v2341_v46  ;;  %v50_v46 = vld [vmem:[%s2749_s0 + $0xb8] sm:$0xff]  ;;  %v762_v24 = vadd.f32 %v2332_v38, %v761_v20 }
  0xe6   :  { %v170_v39 = vpack.c.bf16 %v58_v51, %v50_v46  ;;  %v98_v38 = vld [vmem:[%s2749_s0 + $0x238] sm:$0xff] }
  0xe7   :  { %v2484_v28 = vadd.f32 %v891_v25, %v843_v27  ;;  %v1865_v27 = vld [vmem:[%s2751_s3 + $0x18] sm:$0xff]  ;;  %v940_v11 = vpop.f32.mrf.mxu0 }
  0xe8   :  { %1255 = vmatpush.bf16.msra.mxu0 %v1865_v27  ;;  %v154_v27 = vld [vmem:[%s2749_s0 + $0x3f8] sm:$0xff] }
  0xec   :  { %v844_v34 = vpop.f32.mrf.mxu2 }
  0xed   :  { %v893_v35 = vpop.f32.mrf.mxu3  ;;  %v845_v53 = vadd.f32 %v844_v34, %v796_v31  ;;  %v811_v31 = vadd.f32 %v810_v29, %v762_v24  ;;  %v145_v24 = vld [vmem:[%s2749_s0 + $0x3b0] sm:$0xff]  ;;  %v1862_v29 = vld [vmem:[%s2751_s3] sm:$0xff] }
  0xef   :  { %v2502_v40 = vadd.f32 %v893_v35, %v845_v53  ;;  %v193_v35 = vpack.c.bf16 %v105_v33, %v97_v32 }
  0xf1   :  { %1042 = vmatmul.bf16.gmra.mxu2 %v169_v37 }
  0xf2   :  { %1091 = vmatmul.bf16.gmra.mxu3 %v170_v39 }
  0xf4   :  { %v847_v43 = vpop.f32.mrf.mxu2 }
  0xf5   :  { %v896_v45 = vpop.f32.mrf.mxu3  ;;  %v848_v48 = vadd.f32 %v847_v43, %v2384_v10  ;;  %v66_v10 = vld [vmem:[%s2749_s0 + $0x138] sm:$0xff] }
  0xf6   :  { %v178_v60 = vpack.c.bf16 %v74_v15, %v66_v10 }
  0xf7   :  { %v2507_v49 = vadd.f32 %v896_v45, %v848_v48  ;;  %v1864_v48 = vld [vmem:[%s2751_s3 + $0x10] sm:$0xff] }
  0xf8   :  { %1256 = vmatpush.bf16.msra.mxu0 %v1864_v48 }
  0xfc   :  { %v849_v57 = vpop.f32.mrf.mxu2  ;;  %1257 = vmatpush.bf16.msra.mxu0 %v1863_v1 }
  0xfd   :  { %v898_v58 = vpop.f32.mrf.mxu3  ;;  %v850_v17 = vadd.f32 %v849_v57, %v801_v54  ;;  %v121_v54 = vld [vmem:[%s2749_s0 + $0x2f0] sm:$0xff] }
  0xfe   :  { %v201_v57 = vpack.c.bf16 %v121_v54, %v113_v52 }
  0xff   :  { %v2525_v62 = vadd.f32 %v898_v58, %v850_v17 }
 0x100   :  { %1258 = vmatpush.bf16.msra.mxu0 %v1862_v29 }
 0x101   :  { %1047 = vmatmul.bf16.gmra.mxu2 %v177_v59 }
 0x102   :  { %1096 = vmatmul.bf16.gmra.mxu3 %v178_v60 }
 0x104   :  { %v852_v63 = vpop.f32.mrf.mxu2 }
 0x105   :  { %v901_v0 = vpop.f32.mrf.mxu3  ;;  %v853_v3 = vadd.f32 %v852_v63, %v2421_v36  ;;  %v82_v36 = vld [vmem:[%s2749_s0 + $0x1b8] sm:$0xff] }
 0x106   :  { %v186_v18 = vpack.c.bf16 %v90_v42, %v82_v36 }
 0x107   :  { %v2530_v5 = vadd.f32 %v901_v0, %v853_v3  ;;  %v137_v3 = vld [vmem:[%s2749_s0 + $0x370] sm:$0xff] }
 0x10c   :  { %v854_v12 = vpop.f32.mrf.mxu2 }
 0x10d   :  { %v903_v13 = vpop.f32.mrf.mxu3  ;;  %v855_v44 = vadd.f32 %v854_v12, %v806_v7 }
 0x10f   :  { %v2548_v19 = vadd.f32 %v903_v13, %v855_v44  ;;  %v989_v44 = vpop.f32.mrf.mxu1 }
 0x111   :  { %1052 = vmatmul.bf16.gmra.mxu2 %v185_v16 }
 0x112   :  { %1101 = vmatmul.bf16.gmra.mxu3 %v186_v18 }
 0x114   :  { %v857_v21 = vpop.f32.mrf.mxu2 }
 0x115   :  { %v906_v22 = vpop.f32.mrf.mxu3  ;;  %v858_v25 = vadd.f32 %v857_v21, %v2458_v4  ;;  %v106_v4 = vld [vmem:[%s2749_s0 + $0x278] sm:$0xff]  ;;  %v942_v21 = vpop.f32.mrf.mxu0 }
 0x116   :  { %v194_v53 = vpack.c.bf16 %v106_v4, %v98_v38 }
 0x117   :  { %v2552_v26 = vadd.f32 %v906_v22, %v858_v25  ;;  %v146_v25 = vld [vmem:[%s2749_s0 + $0x3b8] sm:$0xff] }
 0x118   :  { %v218_v4 = vpack.c.bf16 %v154_v27, %v146_v25 }
 0x11c   :  { %v859_v46 = vpop.f32.mrf.mxu2 }
 0x11d   :  { %v908_v51 = vpop.f32.mrf.mxu3  ;;  %v860_v34 = vadd.f32 %v859_v46, %v811_v31 }
 0x11f   :  { %v2569_v37 = vadd.f32 %v908_v51, %v860_v34  ;;  %v945_v51 = vpop.f32.mrf.mxu0 }
 0x121   :  { %1057 = vmatmul.bf16.gmra.mxu2 %v193_v35 }
 0x122   :  { %1106 = vmatmul.bf16.gmra.mxu3 %v194_v53 }
 0x124   :  { %v862_v39 = vpop.f32.mrf.mxu2 }
 0x125   :  { %v911_v43 = vpop.f32.mrf.mxu3  ;;  %v863_v45 = vadd.f32 %v862_v39, %v2344_v50  ;;  %v122_v50 = vld [vmem:[%s2749_s0 + $0x2f8] sm:$0xff] }
 0x126   :  { %v202_v58 = vpack.c.bf16 %v122_v50, %v114_v55  ;;  %v941_v50 = vadd.f32 %v940_v11, %v2484_v28 }
 0x127   :  { %v2572_v47 = vadd.f32 %v911_v43, %v863_v45  ;;  %v947_v45 = vpop.f32.mrf.mxu0 }
 0x12c   :  { %v864_v56 = vpop.f32.mrf.mxu2 }
 0x12d   :  { %v913_v10 = vpop.f32.mrf.mxu3  ;;  %v865_v15 = vadd.f32 %v864_v56, %v2375_v2  ;;  %v129_v2 = vld [vmem:[%s2749_s0 + $0x330] sm:$0xff]  ;;  %v1873_v56 = vld [vmem:[%s2752_s5 + $0x18] sm:$0xff] }
 0x12e   :  { %v209_v42 = vpack.c.bf16 %v137_v3, %v129_v2  ;;  %1421 = vmatpush.bf16.msra.mxu1 %v1873_v56 }
 0x12f   :  { %v2590_v17 = vadd.f32 %v913_v10, %v865_v15 }
 0x131   :  { %1062 = vmatmul.bf16.gmra.mxu2 %v201_v57  ;;  %v950_v57 = vpop.f32.mrf.mxu0 }
 0x132   :  { %1111 = vmatmul.bf16.gmra.mxu3 %v202_v58  ;;  %v943_v58 = vadd.f32 %v942_v21, %v2502_v40 }
 0x134   :  { %v867_v59 = vpop.f32.mrf.mxu2 }
 0x135   :  { %v916_v60 = vpop.f32.mrf.mxu3  ;;  %v868_v63 = vadd.f32 %v867_v59, %v2387_v14  ;;  %v138_v14 = vld [vmem:[%s2749_s0 + $0x378] sm:$0xff] }
 0x136   :  { %v210_v12 = vpack.c.bf16 %v138_v14, %v130_v6 }
 0x137   :  { %v2593_v0 = vadd.f32 %v916_v60, %v868_v63 }
 0x139   :  { %v952_v6 = vpop.f32.mrf.mxu0 }
 0x13c   :  { %v869_v7 = vpop.f32.mrf.mxu2 }
 0x13d   :  { %v918_v9 = vpop.f32.mrf.mxu3  ;;  %v870_v36 = vadd.f32 %v869_v7, %v2418_v30  ;;  %v153_v30 = vld [vmem:[%s2749_s0 + $0x3f0] sm:$0xff]  ;;  %v946_v7 = vadd.f32 %v945_v51, %v2507_v49 }
 0x13e   :  { %v217_v38 = vpack.c.bf16 %v153_v30, %v145_v24 }
 0x13f   :  { %v2611_v13 = vadd.f32 %v918_v9, %v870_v36 }
 0x141   :  { %1067 = vmatmul.bf16.gmra.mxu2 %v209_v42  ;;  %v955_v21 = vpop.f32.mrf.mxu0 }
 0x142   :  { %1116 = vmatmul.bf16.gmra.mxu3 %v210_v12 }
 0x144   :  { %v872_v16 = vpop.f32.mrf.mxu2 }
 0x145   :  { %v921_v18 = vpop.f32.mrf.mxu3  ;;  %v873_v20 = vadd.f32 %v872_v16, %v2424_v41  ;;  %v991_v41 = vpop.f32.mrf.mxu1 }
 0x146   :  { %v992_v63 = vadd.f32 %v991_v41, %v943_v58 }
 0x147   :  { %v2614_v22 = vadd.f32 %v921_v18, %v873_v20  ;;  %v948_v18 = vadd.f32 %v947_v45, %v2525_v62  ;;  %v953_v45 = vadd.f32 %v952_v6, %v2548_v19 }
 0x149   :  { %v957_v62 = vpop.f32.mrf.mxu0 }
 0x14c   :  { %v874_v31 = vpop.f32.mrf.mxu2 }
 0x14d   :  { %v923_v32 = vpop.f32.mrf.mxu3  ;;  %v875_v33 = vadd.f32 %v874_v31, %v2455_v61  ;;  %v994_v53 = vpop.f32.mrf.mxu1 }
 0x14e   :  { %v995_v16 = vadd.f32 %v994_v53, %v946_v7 }
 0x14f   :  { %v2632_v46 = vadd.f32 %v923_v32, %v875_v33  ;;  %v951_v32 = vadd.f32 %v950_v57, %v2530_v5  ;;  %v956_v57 = vadd.f32 %v955_v21, %v2552_v26 }
 0x151   :  { %1072 = vmatmul.bf16.gmra.mxu2 %v217_v38  ;;  %v1872_v38 = vld [vmem:[%s2752_s5 + $0x10] sm:$0xff]  ;;  %v960_v56 = vpop.f32.mrf.mxu0 }
 0x152   :  { %1121 = vmatmul.bf16.gmra.mxu3 %v218_v4  ;;  %1422 = vmatpush.bf16.msra.mxu1 %v1872_v38 }
 0x154   :  { %v877_v34 = vpop.f32.mrf.mxu2 }
 0x155   :  { %v926_v35 = vpop.f32.mrf.mxu3  ;;  %v878_v39 = vadd.f32 %v877_v34, %v2461_v8  ;;  %v996_v54 = vpop.f32.mrf.mxu1  ;;  %v990_v8 = vadd.f32 %v989_v44, %v941_v50 }
 0x156   :  { %v997_v24 = vadd.f32 %v996_v54, %v948_v18 }
 0x157   :  { %v2635_v43 = vadd.f32 %v926_v35, %v878_v39 }
 0x159   :  { %v962_v6 = vpop.f32.mrf.mxu0 }
 0x15c   :  { %v879_v48 = vpop.f32.mrf.mxu2 }
 0x15d   :  { %v928_v52 = vpop.f32.mrf.mxu3  ;;  %v880_v61 = vadd.f32 %v879_v48, %v2479_v23  ;;  %v999_v60 = vpop.f32.mrf.mxu1 }
 0x15e   :  { %v1000_v39 = vadd.f32 %v999_v60, %v951_v32 }
 0x15f   :  { %v2638_v55 = vadd.f32 %v928_v52, %v880_v61 }
 0x164   :  { %v1038_v10 = vpop.f32.mrf.mxu2 }
 0x165   :  { %v1087_v15 = vpop.f32.mrf.mxu3  ;;  %v1039_v59 = vadd.f32 %v1038_v10, %v990_v8  ;;  %v1001_v11 = vpop.f32.mrf.mxu1 }
 0x166   :  { %v1002_v5 = vadd.f32 %v1001_v11, %v953_v45 }
 0x167   :  { %v1088_v23 = vadd.f32 %v1087_v15, %v1039_v59 }
 0x169   :  { %v1143_v28 = vmul.f32 0.01, %v1088_v23  ;;  %vm1127_vm0 = vcmp.gt.f32.partialorder %v1088_v23, 0.0 }
 0x16b   :  { %v1159_v36 = vsel %vm1127_vm0, %v1088_v23, %v1143_v28 }
 0x16c   :  { %v1040_v1 = vpop.f32.mrf.mxu2 }
 0x16d   :  { %v1089_v2 = vpop.f32.mrf.mxu3  ;;  %v1041_v3 = vadd.f32 %v1040_v1, %v992_v63  ;;  %v1004_v41 = vpop.f32.mrf.mxu1 }
 0x16f   :  { %v1090_v14 = vadd.f32 %v1089_v2, %v1041_v3  ;;  %v1005_v2 = vadd.f32 %v1004_v41, %v956_v57  ;;  %v958_v3 = vadd.f32 %v957_v62, %v2569_v37  ;;  %v1871_v37 = vld [vmem:[%s2752_s5 + $0x8] sm:$0xff]  ;;  %v963_v41 = vadd.f32 %v962_v6, %v2590_v17 }
 0x170   :  { %1423 = vmatpush.bf16.msra.mxu1 %v1871_v37 }
 0x171   :  { %vm1128_vm1 = vcmp.gt.f32.partialorder %v1090_v14, 0.0  ;;  %v1144_v9 = vmul.f32 0.01, %v1090_v14 }
 0x173   :  { %v1160_v42 = vsel %vm1128_vm1, %v1090_v14, %v1144_v9 }
 0x174   :  { %v1175_v12 = vpack.c.bf16 %v1160_v42, %v1159_v36  ;;  %v1043_v40 = vpop.f32.mrf.mxu2 }
 0x175   :  { %v1092_v44 = vpop.f32.mrf.mxu3  ;;  %v1044_v20 = vadd.f32 %v1043_v40, %v995_v16  ;;  %v1006_v48 = vpop.f32.mrf.mxu1  ;;  %v961_v40 = vadd.f32 %v960_v56, %v2572_v47 }
 0x176   :  { %1259 = vmatmul.bf16.vlgmr.msra.gmra.mxu0 %v1175_v12  ;;  %v1007_v14 = vadd.f32 %v1006_v48, %v958_v3 }
 0x177   :  { %v1093_v30 = vadd.f32 %v1092_v44, %v1044_v20  ;;  %v965_v44 = vpop.f32.mrf.mxu0 }
 0x179   :  { %v1145_v29 = vmul.f32 0.01, %v1093_v30  ;;  %vm1129_vm2 = vcmp.gt.f32.partialorder %v1093_v30, 0.0 }
 0x17b   :  { %v1161_v4 = vsel %vm1129_vm2, %v1093_v30, %v1145_v29  ;;  %vm1392_vm2 = vcmask 523264  }
 0x17c   :  { %v1045_v25 = vpop.f32.mrf.mxu2 }
 0x17d   :  { %v1094_v27 = vpop.f32.mrf.mxu3  ;;  %v1046_v49 = vadd.f32 %v1045_v25, %v997_v24  ;;  %v1009_v58 = vpop.f32.mrf.mxu1 }
 0x17e   :  { %v1010_v25 = vadd.f32 %v1009_v58, %v961_v40 }
 0x17f   :  { %v1095_v31 = vadd.f32 %v1094_v27, %v1046_v49  ;;  %v967_v29 = vpop.f32.mrf.mxu0 }
 0x181   :  { %vm1130_vm3 = vcmp.gt.f32.partialorder %v1095_v31, 0.0  ;;  %v1146_v33 = vmul.f32 0.01, %v1095_v31 }
 0x183   :  { %v1162_v51 = vsel %vm1130_vm3, %v1095_v31, %v1146_v33 }
 0x184   :  { %v1048_v34 = vpop.f32.mrf.mxu2  ;;  %v1176_v53 = vpack.c.bf16 %v1162_v51, %v1161_v4 }
 0x185   :  { %v1097_v35 = vpop.f32.mrf.mxu3  ;;  %v1049_v52 = vadd.f32 %v1048_v34, %v1000_v39  ;;  %v1011_v7 = vpop.f32.mrf.mxu1  ;;  %v966_v34 = vadd.f32 %v965_v44, %v2593_v0 }
 0x186   :  { %1264 = vmatmul.bf16.gmra.mxu0 %v1176_v53  ;;  %v1012_v47 = vadd.f32 %v1011_v7, %v963_v41 }
 0x187   :  { %v1098_v61 = vadd.f32 %v1097_v35, %v1049_v52 }
 0x189   :  { %v1147_v15 = vmul.f32 0.01, %v1098_v61  ;;  %vm1131_vm4 = vcmp.gt.f32.partialorder %v1098_v61, 0.0 }
 0x18b   :  { %v1163_v60 = vsel %vm1131_vm4, %v1098_v61, %v1147_v15  ;;  %v968_v61 = vadd.f32 %v967_v29, %v2611_v13 }
 0x18c   :  { %v1050_v54 = vpop.f32.mrf.mxu2 }
 0x18d   :  { %v1099_v50 = vpop.f32.mrf.mxu3  ;;  %v1051_v10 = vadd.f32 %v1050_v54, %v1002_v5  ;;  %v1014_v27 = vpop.f32.mrf.mxu1 }
 0x18e   :  { %v1015_v52 = vadd.f32 %v1014_v27, %v966_v34  ;;  %v970_v5 = vpop.f32.mrf.mxu0 }
 0x18f   :  { %v1100_v8 = vadd.f32 %v1099_v50, %v1051_v10 }
 0x191   :  { %vm1132_vm5 = vcmp.gt.f32.partialorder %v1100_v8, 0.0  ;;  %v1148_v59 = vmul.f32 0.01, %v1100_v8 }
 0x193   :  { %v1164_v63 = vsel %vm1132_vm5, %v1100_v8, %v1148_v59 }
 0x194   :  { %v1053_v23 = vpop.f32.mrf.mxu2  ;;  %v1177_v1 = vpack.c.bf16 %v1164_v63, %v1163_v60  ;;  %v971_v60 = vadd.f32 %v970_v5, %v2614_v22 }
 0x195   :  { %v1102_v19 = vpop.f32.mrf.mxu3  ;;  %v1054_v28 = vadd.f32 %v1053_v23, %v1005_v2  ;;  %v1016_v62 = vpop.f32.mrf.mxu1  ;;  %v1870_v23 = vld [vmem:[%s2752_s5] sm:$0xff] }
 0x196   :  { %1269 = vmatmul.bf16.gmra.mxu0 %v1177_v1  ;;  %v1017_v56 = vadd.f32 %v1016_v62, %v968_v61  ;;  %v972_v0 = vpop.f32.mrf.mxu0  ;;  %1424 = vmatpush.bf16.msra.mxu1 %v1870_v23 }
 0x197   :  { %v1103_v9 = vadd.f32 %v1102_v19, %v1054_v28 }
 0x199   :  { %v1149_v42 = vmul.f32 0.01, %v1103_v9  ;;  %vm1133_vm6 = vcmp.gt.f32.partialorder %v1103_v9, 0.0 }
 0x19b   :  { %v1165_v18 = vsel %vm1133_vm6, %v1103_v9, %v1149_v42 }
 0x19c   :  { %v1055_v11 = vpop.f32.mrf.mxu2 }
 0x19d   :  { %v1104_v36 = vpop.f32.mrf.mxu3  ;;  %v1056_v26 = vadd.f32 %v1055_v11, %v1007_v14  ;;  %v1019_v50 = vpop.f32.mrf.mxu1  ;;  %v973_v14 = vadd.f32 %v972_v0, %v2632_v46 }
 0x19e   :  { %v1020_v28 = vadd.f32 %v1019_v50, %v971_v60  ;;  %v975_v9 = vpop.f32.mrf.mxu0 }
 0x19f   :  { %v1105_v12 = vadd.f32 %v1104_v36, %v1056_v26 }
 0x1a1   :  { %vm1134_vm7 = vcmp.gt.f32.partialorder %v1105_v12, 0.0  ;;  %v1150_v16 = vmul.f32 0.01, %v1105_v12 }
 0x1a3   :  { %v1166_v20 = vsel %vm1134_vm7, %v1105_v12, %v1150_v16  ;;  %v976_v16 = vadd.f32 %v975_v9, %v2635_v43 }
 0x1a4   :  { %v1058_v21 = vpop.f32.mrf.mxu2  ;;  %v1178_v30 = vpack.c.bf16 %v1166_v20, %v1165_v18 }
 0x1a5   :  { %v1107_v24 = vpop.f32.mrf.mxu3  ;;  %v1059_v49 = vadd.f32 %v1058_v21, %v1010_v25  ;;  %v1021_v13 = vpop.f32.mrf.mxu1 }
 0x1a6   :  { %1274 = vmatmul.bf16.gmra.mxu0 %v1178_v30  ;;  %v1022_v22 = vadd.f32 %v1021_v13, %v973_v14  ;;  %v977_v18 = vpop.f32.mrf.mxu0 }
 0x1a7   :  { %v1108_v31 = vadd.f32 %v1107_v24, %v1059_v49  ;;  %v978_v27 = vadd.f32 %v977_v18, %v2638_v55  ;;  %v2671_v55 = vld [vmem:[%s2753_s4] ss:$0 sm:$0xff] }
 0x1a9   :  { %v1151_v4 = vmul.f32 0.01, %v1108_v31  ;;  %vm1135_vm8 = vcmp.gt.f32.partialorder %v1108_v31, 0.0 }
 0x1ab   :  { %v1167_v53 = vsel %vm1135_vm8, %v1108_v31, %v1151_v4 }
 0x1ac   :  { %v1060_v32 = vpop.f32.mrf.mxu2 }
 0x1ad   :  { %v1109_v33 = vpop.f32.mrf.mxu3  ;;  %v1061_v38 = vadd.f32 %v1060_v32, %v1012_v47  ;;  %v1024_v12 = vpop.f32.mrf.mxu1 }
 0x1ae   :  { %v1025_v25 = vadd.f32 %v1024_v12, %v976_v16 }
 0x1af   :  { %v1110_v51 = vadd.f32 %v1109_v33, %v1061_v38 }
 0x1b1   :  { %vm1136_vm9 = vcmp.gt.f32.partialorder %v1110_v51, 0.0  ;;  %v1152_v35 = vmul.f32 0.01, %v1110_v51 }
 0x1b3   :  { %v1168_v39 = vsel %vm1136_vm9, %v1110_v51, %v1152_v35 }
 0x1b4   :  { %v1063_v45 = vpop.f32.mrf.mxu2  ;;  %v1179_v17 = vpack.c.bf16 %v1168_v39, %v1167_v53 }
 0x1b5   :  { %v1112_v48 = vpop.f32.mrf.mxu3  ;;  %v1064_v54 = vadd.f32 %v1063_v45, %v1015_v52  ;;  %v1026_v49 = vpop.f32.mrf.mxu1 }
 0x1b6   :  { %1279 = vmatmul.bf16.gmra.mxu0 %v1179_v17  ;;  %v1027_v47 = vadd.f32 %v1026_v49, %v978_v27 }
 0x1b7   :  { %v1113_v10 = vadd.f32 %v1112_v48, %v1064_v54 }
 0x1b9   :  { %v1153_v58 = vmul.f32 0.01, %v1113_v10  ;;  %vm1137_vm10 = vcmp.gt.f32.partialorder %v1113_v10, 0.0 }
 0x1bb   :  { %v1169_v19 = vsel %vm1137_vm10, %v1113_v10, %v1153_v58 }
 0x1bc   :  { %v1065_v15 = vpop.f32.mrf.mxu2 }
 0x1bd   :  { %v1114_v8 = vpop.f32.mrf.mxu3  ;;  %v1066_v57 = vadd.f32 %v1065_v15, %v1017_v56 }
 0x1bf   :  { %v1115_v59 = vadd.f32 %v1114_v8, %v1066_v57 }
 0x1c1   :  { %vm1138_vm11 = vcmp.gt.f32.partialorder %v1115_v59, 0.0  ;;  %v1154_v63 = vmul.f32 0.01, %v1115_v59 }
 0x1c3   :  { %v1170_v1 = vsel %vm1138_vm11, %v1115_v59, %v1154_v63 }
 0x1c4   :  { %v1068_v2 = vpop.f32.mrf.mxu2  ;;  %v1180_v6 = vpack.c.bf16 %v1170_v1, %v1169_v19 }
 0x1c5   :  { %v1117_v3 = vpop.f32.mrf.mxu3  ;;  %v1069_v7 = vadd.f32 %v1068_v2, %v1020_v28 }
 0x1c6   :  { %1284 = vmatmul.bf16.gmra.mxu0 %v1180_v6 }
 0x1c7   :  { %v1118_v11 = vadd.f32 %v1117_v3, %v1069_v7 }
 0x1c9   :  { %v1155_v40 = vmul.f32 0.01, %v1118_v11  ;;  %vm1139_vm12 = vcmp.gt.f32.partialorder %v1118_v11, 0.0 }
 0x1cb   :  { %v1171_v20 = vsel %vm1139_vm12, %v1118_v11, %v1155_v40 }
 0x1cc   :  { %v1070_v36 = vpop.f32.mrf.mxu2 }
 0x1cd   :  { %v1119_v26 = vpop.f32.mrf.mxu3  ;;  %v1071_v42 = vadd.f32 %v1070_v36, %v1022_v22 }
 0x1cf   :  { %v1120_v44 = vadd.f32 %v1119_v26, %v1071_v42 }
 0x1d1   :  { %vm1140_vm13 = vcmp.gt.f32.partialorder %v1120_v44, 0.0  ;;  %v1156_v37 = vmul.f32 0.01, %v1120_v44 }
 0x1d3   :  { %v1172_v21 = vsel %vm1140_vm13, %v1120_v44, %v1156_v37 }
 0x1d4   :  { %v1073_v24 = vpop.f32.mrf.mxu2  ;;  %v1181_v30 = vpack.c.bf16 %v1172_v21, %v1171_v20 }
 0x1d5   :  { %v1122_v46 = vpop.f32.mrf.mxu3  ;;  %v1074_v41 = vadd.f32 %v1073_v24, %v1025_v25 }
 0x1d6   :  { %1289 = vmatmul.bf16.gmra.mxu0 %v1181_v30 }
 0x1d7   :  { %v1123_v29 = vadd.f32 %v1122_v46, %v1074_v41 }
 0x1d9   :  { %v1157_v43 = vmul.f32 0.01, %v1123_v29  ;;  %vm1141_vm14 = vcmp.gt.f32.partialorder %v1123_v29, 0.0 }
 0x1db   :  { %v1173_v4 = vsel %vm1141_vm14, %v1123_v29, %v1157_v43 }
 0x1dc   :  { %v1075_v31 = vpop.f32.mrf.mxu2 }
 0x1dd   :  { %v1076_v32 = vadd.f32 %v1075_v31, %v1027_v47  ;;  %v1124_v33 = vpop.f32.mrf.mxu3 }
 0x1df   :  { %v1125_v38 = vadd.f32 %v1124_v33, %v1076_v32 }
 0x1e1   :  { %vm1142_vm15 = vcmp.gt.f32.partialorder %v1125_v38, 0.0  ;;  %v1158_v62 = vmul.f32 0.01, %v1125_v38 }
 0x1e3   :  { %v1174_v51 = vsel %vm1142_vm15, %v1125_v38, %v1158_v62 }
 0x1e4   :  { %v1182_v34 = vpack.c.bf16 %v1174_v51, %v1173_v4 }
 0x1e6   :  { %1294 = vmatmul.bf16.gmra.mxu0 %v1182_v34 }
 0x1f3   :  { %v1260_v35 = vpop.f32.mrf.mxu0 }
 0x1f4   :  { %v1261_v53 = vadd.f32 %v2671_v55, %v1260_v35 }
 0x1f6   :  { %v1316_v45 = vmul.f32 0.01, %v1261_v53  ;;  %vm1300_vm0 = vcmp.gt.f32.partialorder %v1261_v53, 0.0 }
 0x1f8   :  { %v1332_v52 = vsel %vm1300_vm0, %v1261_v53, %v1316_v45 }
 0x1fb   :  { %v1262_v39 = vpop.f32.mrf.mxu0 }
 0x1fc   :  { %v1263_v48 = vadd.f32 %v2671_v55, %v1262_v39 }
 0x1fe   :  { %vm1301_vm1 = vcmp.gt.f32.partialorder %v1263_v48, 0.0  ;;  %v1317_v17 = vmul.f32 0.01, %v1263_v48 }
 0x200   :  { %v1333_v5 = vsel %vm1301_vm1, %v1263_v48, %v1317_v17 }
 0x201   :  { %v1348_v61 = vpack.c.bf16 %v1333_v5, %v1332_v52 }
 0x203   :  { %v1265_v54 = vpop.f32.mrf.mxu0  ;;  %1790 = vmatmul.msk.bf16.vlgmr.msra.gmra.mxu1 %vm1392_vm2, %v1348_v61 }
 0x204   :  { %v1266_v50 = vadd.f32 %v2671_v55, %v1265_v54  ;;  %v1892_v54 = vld [vmem:[%s2754_s6] ss:$0 sm:$0xff] }
 0x206   :  { %v1318_v10 = vmul.f32 0.01, %v1266_v50  ;;  %vm1302_vm3 = vcmp.gt.f32.partialorder %v1266_v50, 0.0 }
 0x208   :  { %v1334_v57 = vsel %vm1302_vm3, %v1266_v50, %v1318_v10 }
 0x20b   :  { %v1267_v56 = vpop.f32.mrf.mxu0 }
 0x20c   :  { %v1268_v15 = vadd.f32 %v2671_v55, %v1267_v56 }
 0x20e   :  { %vm1303_vm4 = vcmp.gt.f32.partialorder %v1268_v15, 0.0  ;;  %v1319_v8 = vmul.f32 0.01, %v1268_v15 }
 0x210   :  { %v1335_v0 = vsel %vm1303_vm4, %v1268_v15, %v1319_v8 }
 0x211   :  { %v1349_v58 = vpack.c.bf16 %v1335_v0, %v1334_v57 }
 0x213   :  { %v1270_v59 = vpop.f32.mrf.mxu0  ;;  %1791 = vmatmul.msk.bf16.gmra.mxu1 %vm1392_vm2, %v1349_v58 }
 0x214   :  { %v1271_v60 = vadd.f32 %v2671_v55, %v1270_v59 }
 0x216   :  { %v1320_v23 = vmul.f32 0.01, %v1271_v60  ;;  %vm1304_vm5 = vcmp.gt.f32.partialorder %v1271_v60, 0.0 }
 0x218   :  { %v1336_v1 = vsel %vm1304_vm5, %v1271_v60, %v1320_v23 }
 0x21b   :  { %v1272_v63 = vpop.f32.mrf.mxu0 }
 0x21c   :  { %v1273_v13 = vadd.f32 %v2671_v55, %v1272_v63 }
 0x21e   :  { %vm1305_vm6 = vcmp.gt.f32.partialorder %v1273_v13, 0.0  ;;  %v1321_v19 = vmul.f32 0.01, %v1273_v13 }
 0x220   :  { %v1337_v2 = vsel %vm1305_vm6, %v1273_v13, %v1321_v19 }
 0x221   :  { %v1350_v3 = vpack.c.bf16 %v1337_v2, %v1336_v1 }
 0x223   :  { %v1275_v6 = vpop.f32.mrf.mxu0  ;;  %1792 = vmatmul.msk.bf16.gmra.mxu1 %vm1392_vm2, %v1350_v3 }
 0x224   :  { %v1276_v28 = vadd.f32 %v2671_v55, %v1275_v6 }
 0x226   :  { %v1322_v7 = vmul.f32 0.01, %v1276_v28  ;;  %vm1306_vm7 = vcmp.gt.f32.partialorder %v1276_v28, 0.0 }
 0x228   :  { %v1338_v11 = vsel %vm1306_vm7, %v1276_v28, %v1322_v7 }
 0x22b   :  { %v1277_v14 = vpop.f32.mrf.mxu0 }
 0x22c   :  { %v1278_v9 = vadd.f32 %v2671_v55, %v1277_v14 }
 0x22e   :  { %vm1307_vm8 = vcmp.gt.f32.partialorder %v1278_v9, 0.0  ;;  %v1323_v22 = vmul.f32 0.01, %v1278_v9 }
 0x230   :  { %v1339_v36 = vsel %vm1307_vm8, %v1278_v9, %v1323_v22 }
 0x231   :  { %v1351_v26 = vpack.c.bf16 %v1339_v36, %v1338_v11 }
 0x233   :  { %v1280_v42 = vpop.f32.mrf.mxu0  ;;  %1793 = vmatmul.msk.bf16.gmra.mxu1 %vm1392_vm2, %v1351_v26 }
 0x234   :  { %v1281_v12 = vadd.f32 %v2671_v55, %v1280_v42 }
 0x236   :  { %v1324_v44 = vmul.f32 0.01, %v1281_v12  ;;  %vm1308_vm9 = vcmp.gt.f32.partialorder %v1281_v12, 0.0 }
 0x238   :  { %v1340_v18 = vsel %vm1308_vm9, %v1281_v12, %v1324_v44 }
 0x23b   :  { %v1282_v40 = vpop.f32.mrf.mxu0 }
 0x23c   :  { %v1283_v16 = vadd.f32 %v2671_v55, %v1282_v40 }
 0x23e   :  { %vm1309_vm10 = vcmp.gt.f32.partialorder %v1283_v16, 0.0  ;;  %v1325_v37 = vmul.f32 0.01, %v1283_v16 }
 0x240   :  { %v1341_v20 = vsel %vm1309_vm10, %v1283_v16, %v1325_v37 }
 0x241   :  { %v1352_v21 = vpack.c.bf16 %v1341_v20, %v1340_v18 }
 0x243   :  { %v1285_v24 = vpop.f32.mrf.mxu0  ;;  %1794 = vmatmul.msk.bf16.gmra.mxu1 %vm1392_vm2, %v1352_v21 }
 0x244   :  { %v1286_v46 = vadd.f32 %v2671_v55, %v1285_v24 }
 0x246   :  { %v1326_v25 = vmul.f32 0.01, %v1286_v46  ;;  %vm1310_vm11 = vcmp.gt.f32.partialorder %v1286_v46, 0.0 }
 0x248   :  { %v1342_v49 = vsel %vm1310_vm11, %v1286_v46, %v1326_v25 }
 0x24b   :  { %v1287_v30 = vpop.f32.mrf.mxu0 }
 0x24c   :  { %v1288_v27 = vadd.f32 %v2671_v55, %v1287_v30 }
 0x24e   :  { %vm1311_vm12 = vcmp.gt.f32.partialorder %v1288_v27, 0.0  ;;  %v1327_v41 = vmul.f32 0.01, %v1288_v27 }
 0x250   :  { %v1343_v47 = vsel %vm1311_vm12, %v1288_v27, %v1327_v41 }
 0x251   :  { %v1353_v29 = vpack.c.bf16 %v1343_v47, %v1342_v49 }
 0x253   :  { %v1290_v31 = vpop.f32.mrf.mxu0  ;;  %1795 = vmatmul.msk.bf16.gmra.mxu1 %vm1392_vm2, %v1353_v29 }
 0x254   :  { %v1291_v32 = vadd.f32 %v2671_v55, %v1290_v31 }
 0x256   :  { %v1328_v43 = vmul.f32 0.01, %v1291_v32  ;;  %vm1312_vm13 = vcmp.gt.f32.partialorder %v1291_v32, 0.0 }
 0x258   :  { %v1344_v4 = vsel %vm1312_vm13, %v1291_v32, %v1328_v43 }
 0x25b   :  { %v1292_v33 = vpop.f32.mrf.mxu0 }
 0x25c   :  { %v1293_v38 = vadd.f32 %v2671_v55, %v1292_v33 }
 0x25e   :  { %vm1313_vm14 = vcmp.gt.f32.partialorder %v1293_v38, 0.0  ;;  %v1329_v62 = vmul.f32 0.01, %v1293_v38 }
 0x260   :  { %v1345_v51 = vsel %vm1313_vm14, %v1293_v38, %v1329_v62 }
 0x261   :  { %v1354_v34 = vpack.c.bf16 %v1345_v51, %v1344_v4 }
 0x263   :  { %v1295_v35 = vpop.f32.mrf.mxu0  ;;  %1796 = vmatmul.msk.bf16.gmra.mxu1 %vm1392_vm2, %v1354_v34 }
 0x264   :  { %v1296_v53 = vadd.f32 %v2671_v55, %v1295_v35 }
 0x266   :  { %v1330_v45 = vmul.f32 0.01, %v1296_v53  ;;  %vm1314_vm15 = vcmp.gt.f32.partialorder %v1296_v53, 0.0 }
 0x268   :  { %v1346_v52 = vsel %vm1314_vm15, %v1296_v53, %v1330_v45 }
 0x26b   :  { %v1297_v39 = vpop.f32.mrf.mxu0 }
 0x26c   :  { %v1298_v48 = vadd.f32 %v2671_v55, %v1297_v39 }
 0x26e   :  { %vm1315_vm0 = vcmp.gt.f32.partialorder %v1298_v48, 0.0  ;;  %v1331_v17 = vmul.f32 0.01, %v1298_v48 }
 0x270   :  { %v1347_v5 = vsel %vm1315_vm0, %v1298_v48, %v1331_v17 }
 0x271   :  { %v1355_v61 = vpack.c.bf16 %v1347_v5, %v1346_v52 }
 0x273   :  { %1797 = vmatmul.msk.bf16.gmra.mxu1 %vm1392_vm2, %v1355_v61 }
 0x280   :  { %v1426_v50 = vpop.f32.mrf.mxu1 }
 0x281   :  { %v1427_v56 = vadd.f32 %v1892_v54, %v1426_v50 }
 0x283   :  { %1466 = vst [vmem:[%s2755_s7] sm:$0xff] %v1427_v56 }
 0x288   :  { %v1428_v10 = vpop.f32.mrf.mxu1 }
 0x289   :  { %v1429_v55 = vadd.f32 %v1892_v54, %v1428_v10 }
 0x28b   :  { %1467 = vst [vmem:[%s2755_s7 + $0x8] sm:$0xff] %v1429_v55 }
 0x290   :  { %v1431_v15 = vpop.f32.mrf.mxu1 }
 0x291   :  { %v1432_v8 = vadd.f32 %v1892_v54, %v1431_v15 }
 0x293   :  { %1468 = vst [vmem:[%s2755_s7 + $0x10] sm:$0xff] %v1432_v8 }
 0x298   :  { %v1433_v57 = vpop.f32.mrf.mxu1 }
 0x299   :  { %v1434_v0 = vadd.f32 %v1892_v54, %v1433_v57 }
 0x29b   :  { %1469 = vst [vmem:[%s2755_s7 + $0x18] sm:$0xff] %v1434_v0 }
 0x2a0   :  { %v1436_v58 = vpop.f32.mrf.mxu1 }
 0x2a1   :  { %v1437_v59 = vadd.f32 %v1892_v54, %v1436_v58 }
 0x2a3   :  { %1470 = vst [vmem:[%s2755_s7 + $0x20] sm:$0xff] %v1437_v59 }
 0x2a8   :  { %v1438_v60 = vpop.f32.mrf.mxu1 }
 0x2a9   :  { %v1439_v63 = vadd.f32 %v1892_v54, %v1438_v60 }
 0x2ab   :  { %1471 = vst [vmem:[%s2755_s7 + $0x28] sm:$0xff] %v1439_v63 }
 0x2b0   :  { %v1441_v23 = vpop.f32.mrf.mxu1 }
 0x2b1   :  { %v1442_v13 = vadd.f32 %v1892_v54, %v1441_v23 }
 0x2b3   :  { %1472 = vst [vmem:[%s2755_s7 + $0x30] sm:$0xff] %v1442_v13 }
 0x2b8   :  { %v1443_v19 = vpop.f32.mrf.mxu1 }
 0x2b9   :  { %v1444_v1 = vadd.f32 %v1892_v54, %v1443_v19 }
 0x2bb   :  { %1473 = vst [vmem:[%s2755_s7 + $0x38] sm:$0xff] %v1444_v1 }
 0x2c0   :  { %v1446_v2 = vpop.f32.mrf.mxu1 }
 0x2c1   :  { %v1447_v3 = vadd.f32 %v1892_v54, %v1446_v2 }
 0x2c3   :  { %1474 = vst [vmem:[%s2755_s7 + $0x40] sm:$0xff] %v1447_v3 }
 0x2c8   :  { %v1448_v6 = vpop.f32.mrf.mxu1 }
 0x2c9   :  { %v1449_v28 = vadd.f32 %v1892_v54, %v1448_v6 }
 0x2cb   :  { %1475 = vst [vmem:[%s2755_s7 + $0x48] sm:$0xff] %v1449_v28 }
 0x2d0   :  { %v1451_v14 = vpop.f32.mrf.mxu1 }
 0x2d1   :  { %v1452_v7 = vadd.f32 %v1892_v54, %v1451_v14 }
 0x2d3   :  { %1476 = vst [vmem:[%s2755_s7 + $0x50] sm:$0xff] %v1452_v7 }
 0x2d8   :  { %v1453_v9 = vpop.f32.mrf.mxu1 }
 0x2d9   :  { %v1454_v22 = vadd.f32 %v1892_v54, %v1453_v9 }
 0x2db   :  { %1477 = vst [vmem:[%s2755_s7 + $0x58] sm:$0xff] %v1454_v22 }
 0x2e0   :  { %v1456_v11 = vpop.f32.mrf.mxu1 }
 0x2e1   :  { %v1457_v36 = vadd.f32 %v1892_v54, %v1456_v11 }
 0x2e3   :  { %1478 = vst [vmem:[%s2755_s7 + $0x60] sm:$0xff] %v1457_v36 }
 0x2e8   :  { %v1458_v26 = vpop.f32.mrf.mxu1 }
 0x2e9   :  { %v1459_v42 = vadd.f32 %v1892_v54, %v1458_v26 }
 0x2eb   :  { %1479 = vst [vmem:[%s2755_s7 + $0x68] sm:$0xff] %v1459_v42 }
 0x2f0   :  { %v1461_v12 = vpop.f32.mrf.mxu1 }
 0x2f1   :  { %v1462_v40 = vadd.f32 %v1892_v54, %v1461_v12 }
 0x2f3   :  { %1480 = vst [vmem:[%s2755_s7 + $0x70] sm:$0xff] %v1462_v40 }
 0x2f8   :  { %v1463_v44 = vpop.f32.mrf.mxu1 }
 0x2f9   :  { %v1464_v16 = vadd.f32 %v1892_v54, %v1463_v44 }
 0x2fb   :  { %1481 = vst [vmem:[%s2755_s7 + $0x78] sm:$0xff] %v1464_v16 }

</bundles_post_ra>
